<compile_context>
chip_gen: v5e
topology: v5e:2x2
jax: 0.10.0
libtpu: 0.0.40
codegen_flags: <defaults>
</compile_context>

<pallas_src>
import functools

import jax
import jax.numpy as jnp
from jax.experimental import pallas as pl
from jax.experimental.pallas import tpu as pltpu

LN_EPS = 1e-5   # PyTorch nn.LayerNorm default eps
LANE = 128      # TPU lane width


def _round_up(x, m):
    return (x + m - 1) // m * m


def _layernorm_relu(h, n_logical):
    """LayerNorm(elementwise_affine=False) + ReLU over the last dim (f32 math).

    `h` may be zero-padded along the last dim; padded lanes are exactly zero, so
    full-lane sums divided by the *logical* feature count give exact statistics
    with no mask.  The fused one-pass variance (E[x^2]-mu^2, clamped at 0) can lose
    precision when |mu| >> std; fine at f32 for TD3-scale activations.
    """
    inv_n = 1.0 / float(n_logical)
    s = jnp.sum(h, axis=-1, keepdims=True)
    s2 = jnp.sum(h * h, axis=-1, keepdims=True)
    mu = s * inv_n
    var = jnp.maximum(s2 * inv_n - mu * mu, 0.0)
    hn = (h - mu) * jax.lax.rsqrt(var + LN_EPS)
    return jnp.maximum(hn, 0.0)


def _qfunc_kernel(x_ref, w1_ref, b1_ref, w2_ref, b2_ref, w3_ref, b3_ref,
                  out_ref, *, n1, n2, mxu_dtype):
    f32 = jnp.float32

    # ---- Layer 1: single merged Linear (concat done in wrapper) -> LN -> ReLU ----
    h = jnp.dot(x_ref[...], w1_ref[...], preferred_element_type=f32) + b1_ref[...]
    h = _layernorm_relu(h, n1)

    # ---- Layer 2: Linear -> LN -> ReLU ----
    h = jnp.dot(h.astype(mxu_dtype), w2_ref[...], preferred_element_type=f32) + b2_ref[...]
    h = _layernorm_relu(h, n2)

    # ---- Output layer: w3 replicated over 128 lanes -> lane-dense (tb,128) store ----
    q = jnp.dot(h.astype(mxu_dtype), w3_ref[...], preferred_element_type=f32) + b3_ref[0, 0]
    out_ref[...] = q.astype(out_ref.dtype)


def _default_min_grid_steps():
    """2 on dual-TensorCore chips (v7x) so the 'parallel' batch axis can shard."""
    try:
        kind = jax.devices()[0].device_kind.lower()
    except Exception:
        return 1
    return 2 if ("v7" in kind or "7x" in kind) else 1


def _choose_tiling(B, batch_tile, min_steps):
    """Smallest grid g with tb = round_up(ceil(B/g), 128) <= batch_tile (minimizes
    zero-row padding); g forced to >= min_steps when the batch is big enough."""
    cap = max(LANE, _round_up(int(batch_tile), LANE))
    min_steps = max(1, min(int(min_steps), _round_up(B, LANE) // LANE))
    g = min_steps
    while _round_up(pl.cdiv(B, g), LANE) > cap:
        g += 1
    tb = _round_up(pl.cdiv(B, g), LANE)
    return tb, g


def mlp_q_function(obs, act, params, *, batch_tile=1024, mxu_dtype=jnp.bfloat16,
                   min_grid_steps=None):
    """Pallas implementation of MLPQFunction.forward (returns shape (B,)).

    Matmul operands run in `mxu_dtype` (default bf16, MXU-native); bias/LayerNorm/
    accumulation math is always f32.  Use mxu_dtype=jnp.float32 for exact numerics.
    """
    w1, b1, w2, b2, w3, b3 = params
    B, obs_dim = obs.shape
    act_dim = act.shape[1]
    in_dim = obs_dim + act_dim
    h1, h2 = w1.shape[1], w2.shape[1]

    f32 = jnp.float32
    wdt = jnp.dtype(mxu_dtype)
    h1p, h2p = _round_up(h1, LANE), _round_up(h2, LANE)

    # --- Pack weights once in the wrapper: pad hidden dims to 128 lanes, pre-cast to
    #     the MXU dtype, replicate w3 over 128 output lanes.
    #     NOTE: padded rows/cols/lanes must stay exactly zero — the mask-free LN
    #     statistics and padded-lane annihilation by the next weight depend on it.
    w1p = jnp.zeros((in_dim, h1p), wdt).at[:, :h1].set(w1.astype(wdt))
    b1p = jnp.zeros((1, h1p), f32).at[:, :h1].set(b1.reshape(1, h1).astype(f32))
    w2p = jnp.zeros((h1p, h2p), wdt).at[:h1, :h2].set(w2.astype(wdt))
    b2p = jnp.zeros((1, h2p), f32).at[:, :h2].set(b2.reshape(1, h2).astype(f32))
    w3r = jnp.zeros((h2p, LANE), wdt).at[:h2, :].set(
        jnp.broadcast_to(w3.reshape(h2, 1).astype(wdt), (h2, LANE)))
    b3s = b3.reshape(1, 1).astype(f32)

    # --- Streamed input: concat obs/act once (enables the single layer-1 dot).
    x = jnp.concatenate([obs, act], axis=-1).astype(wdt)

    # --- Batch tiling: minimize padding; >= 2 grid steps on dual-core chips.
    if min_grid_steps is None:
        min_grid_steps = _default_min_grid_steps()
    tb, g = _choose_tiling(B, batch_tile, min_grid_steps)
    Bp = tb * g
    if Bp != B:
        x = jnp.pad(x, ((0, Bp - B), (0, 0)))

    isz = wdt.itemsize
    flops = int(2 * Bp * (in_dim * h1p + h1p * h2p + h2p * LANE))
    bytes_accessed = int(Bp * in_dim * isz
                         + (in_dim * h1p + h1p * h2p + h2p * LANE) * isz
                         + 4 * (h1p + h2p + 1)
                         + 4 * Bp * LANE)

    out = pl.pallas_call(
        functools.partial(_qfunc_kernel, n1=h1, n2=h2, mxu_dtype=wdt),
        out_shape=jax.ShapeDtypeStruct((Bp, LANE), f32),
        grid=(g,),
        in_specs=[
            pl.BlockSpec((tb, in_dim), lambda i: (i, 0)),        # x tile (streamed)
            pl.BlockSpec((in_dim, h1p), lambda i: (0, 0)),       # weights pinned in VMEM
            pl.BlockSpec((1, h1p), lambda i: (0, 0)),
            pl.BlockSpec((h1p, h2p), lambda i: (0, 0)),
            pl.BlockSpec((1, h2p), lambda i: (0, 0)),
            pl.BlockSpec((h2p, LANE), lambda i: (0, 0)),
            pl.BlockSpec(memory_space=pltpu.MemorySpace.SMEM),   # b3 scalar in SMEM
        ],
        out_specs=pl.BlockSpec((tb, LANE), lambda i: (i, 0)),    # lane-dense q tile
        compiler_params=pltpu.CompilerParams(
            dimension_semantics=("parallel",)),
        cost_estimate=pl.CostEstimate(
            flops=flops, transcendentals=int(2 * Bp), bytes_accessed=bytes_accessed),
    )(x, w1p, b1p, w2p, b2p, w3r, b3s)

    # torch.squeeze(q, -1); lanes 1..127 are replicas of lane 0, padded rows dropped.
    return out[:B, 0]


def init_params(key, obs_dim, act_dim, hidden_sizes):
    """PyTorch-style Linear init: U(-1/sqrt(fan_in), 1/sqrt(fan_in)) (logical shapes)."""
    sizes = [obs_dim + act_dim] + list(hidden_sizes) + [1]
    params = []
    for j in range(len(sizes) - 1):
        fan_in, fan_out = sizes[j], sizes[j + 1]
        key, kw, kb = jax.random.split(key, 3)
        bound = 1.0 / jnp.sqrt(float(fan_in))
        w = jax.random.uniform(kw, (fan_in, fan_out), jnp.float32, -bound, bound)
        b = jax.random.uniform(kb, (1, fan_out), jnp.float32, -bound, bound)
        params += [w, b]
    return tuple(params)


def _reference(obs, act, params):
    """Pure-JAX reference identical to the PyTorch module's forward."""
    w1, b1, w2, b2, w3, b3 = params
    x = jnp.concatenate([obs, act], axis=-1)

    def ln(h):
        mu = h.mean(-1, keepdims=True)
        var = jnp.mean(jnp.square(h - mu), -1, keepdims=True)   # biased, like torch LN
        return (h - mu) * jax.lax.rsqrt(var + LN_EPS)

    h = jnp.maximum(ln(x @ w1 + b1), 0.0)
    h = jnp.maximum(ln(h @ w2 + b2), 0.0)
    return jnp.squeeze(h @ w3 + b3, -1)


if __name__ == "__main__":
    # Small TD3-critic-like shapes: activation=ReLU, layernorm=True.
    batch, obs_dim, act_dim = 4, 16, 8
    hidden_sizes = (32, 32)

    key = jax.random.PRNGKey(0)
    kp, ko, ka = jax.random.split(key, 3)
    params = init_params(kp, obs_dim, act_dim, hidden_sizes)
    obs = jax.random.normal(ko, (batch, obs_dim), jnp.float32)
    act = jax.random.normal(ka, (batch, act_dim), jnp.float32)

    q_ref = _reference(obs, act, params)

    # Exact path (f32 MXU operands): tight tolerance.
    q32 = jax.block_until_ready(mlp_q_function(obs, act, params, mxu_dtype=jnp.float32))
    assert q32.shape == (batch,), q32.shape
    assert jnp.allclose(q32, q_ref, atol=1e-4, rtol=1e-4), (q32, q_ref)

    # Default bf16-operand path (f32 accumulation): looser tolerance.
    qbf = jax.block_until_ready(mlp_q_function(obs, act, params))
    assert qbf.shape == (batch,), qbf.shape
    assert jnp.allclose(qbf, q_ref, atol=5e-2, rtol=5e-2), (qbf, q_ref)

    # Multi-grid-step + batch-padding path (f32, forced small tile, >=2 steps).
    B2 = 260
    ko2, ka2 = jax.random.split(jax.random.PRNGKey(1))
    obs2 = jax.random.normal(ko2, (B2, obs_dim), jnp.float32)
    act2 = jax.random.normal(ka2, (B2, act_dim), jnp.float32)
    q2 = jax.block_until_ready(
        mlp_q_function(obs2, act2, params, batch_tile=128, mxu_dtype=jnp.float32,
                       min_grid_steps=2))
    q2_ref = _reference(obs2, act2, params)
    assert q2.shape == (B2,), q2.shape
    assert jnp.allclose(q2, q2_ref, atol=1e-4, rtol=1e-4), (q2, q2_ref)

    print("KERNEL_OK")
</pallas_src>

<mosaic_0001>
module attributes {stable_mosaic.version = 11 : i64} {
  func.func @_qfunc_kernel(%arg0: i32, %arg1: memref<128x24xf32, #tpu.memory_space<vmem>>, %arg2: memref<24x128xf32, #tpu.memory_space<vmem>>, %arg3: memref<1x128xf32, #tpu.memory_space<vmem>>, %arg4: memref<128x128xf32, #tpu.memory_space<vmem>>, %arg5: memref<1x128xf32, #tpu.memory_space<vmem>>, %arg6: memref<128x128xf32, #tpu.memory_space<vmem>>, %arg7: memref<1x1xf32, #tpu.memory_space<smem>>, %arg8: memref<128x128xf32, #tpu.memory_space<vmem>>) attributes {dimension_semantics = [#tpu.dimension_semantics<parallel>], iteration_bounds = array<i64: 1>, scalar_prefetch = 0 : i64, scratch_operands = 0 : i64, tpu.core_type = #tpu.core_type<tc>, window_params = [{transform_indices = @transform_0, window_bounds = array<i64: 128, 24>}, {pipeline_mode = #tpu.pipeline_mode<synchronous>, transform_indices = @transform_1, window_bounds = array<i64: 24, 128>}, {pipeline_mode = #tpu.pipeline_mode<synchronous>, transform_indices = @transform_2, window_bounds = array<i64: 1, 128>}, {pipeline_mode = #tpu.pipeline_mode<synchronous>, transform_indices = @transform_3, window_bounds = array<i64: 128, 128>}, {pipeline_mode = #tpu.pipeline_mode<synchronous>, transform_indices = @transform_4, window_bounds = array<i64: 1, 128>}, {pipeline_mode = #tpu.pipeline_mode<synchronous>, transform_indices = @transform_5, window_bounds = array<i64: 128, 128>}, {transform_indices = @transform_6, window_bounds = array<i64: 1, 1>}, {transform_indices = @transform_7, window_bounds = array<i64: 128, 128>}]} {
    %c0 = arith.constant 0 : index
    %c0_0 = arith.constant 0 : index
    %0 = vector.load %arg1[%c0, %c0_0] : memref<128x24xf32, #tpu.memory_space<vmem>>, vector<128x24xf32>
    %c0_1 = arith.constant 0 : index
    %c0_2 = arith.constant 0 : index
    %1 = vector.load %arg2[%c0_1, %c0_2] : memref<24x128xf32, #tpu.memory_space<vmem>>, vector<24x128xf32>
    %cst = arith.constant dense<0.000000e+00> : vector<128x128xf32>
    %2 = tpu.matmul %0, %1, %cst {dimension_numbers = #tpu.dot_dimension_numbers<[1], [0], [0], [1], [0, 0, 1, 1], [], []>} : vector<128x24xf32>, vector<24x128xf32>, vector<128x128xf32> -> vector<128x128xf32>
    %c0_3 = arith.constant 0 : index
    %c0_4 = arith.constant 0 : index
    %3 = vector.load %arg3[%c0_3, %c0_4] : memref<1x128xf32, #tpu.memory_space<vmem>>, vector<1x128xf32>
    %4 = vector.broadcast %3 : vector<1x128xf32> to vector<128x128xf32>
    %5 = arith.addf %2, %4 : vector<128x128xf32>
    %cst_5 = arith.constant dense<0.000000e+00> : vector<128xf32>
    %6 = vector.multi_reduction <add>, %5, %cst_5 [1] : vector<128x128xf32> to vector<128xf32>
    %7 = vector.shape_cast %6 : vector<128xf32> to vector<128x1xf32>
    %8 = arith.mulf %5, %5 : vector<128x128xf32>
    %cst_6 = arith.constant dense<0.000000e+00> : vector<128xf32>
    %9 = vector.multi_reduction <add>, %8, %cst_6 [1] : vector<128x128xf32> to vector<128xf32>
    %10 = vector.shape_cast %9 : vector<128xf32> to vector<128x1xf32>
    %cst_7 = arith.constant 3.125000e-02 : f32
    %11 = vector.broadcast %cst_7 : f32 to vector<128x1xf32>
    %12 = arith.mulf %7, %11 : vector<128x1xf32>
    %cst_8 = arith.constant 3.125000e-02 : f32
    %13 = vector.broadcast %cst_8 : f32 to vector<128x1xf32>
    %14 = arith.mulf %10, %13 : vector<128x1xf32>
    %15 = arith.mulf %12, %12 : vector<128x1xf32>
    %16 = arith.subf %14, %15 : vector<128x1xf32>
    %cst_9 = arith.constant 0.000000e+00 : f32
    %17 = vector.broadcast %cst_9 : f32 to vector<128x1xf32>
    %18 = arith.maximumf %16, %17 : vector<128x1xf32>
    %19 = vector.broadcast %12 : vector<128x1xf32> to vector<128x128xf32>
    %20 = arith.subf %5, %19 : vector<128x128xf32>
    %cst_10 = arith.constant 9.99999974E-6 : f32
    %21 = vector.broadcast %cst_10 : f32 to vector<128x1xf32>
    %22 = arith.addf %18, %21 : vector<128x1xf32>
    %23 = math.rsqrt %22 : vector<128x1xf32>
    %24 = vector.broadcast %23 : vector<128x1xf32> to vector<128x128xf32>
    %25 = arith.mulf %20, %24 : vector<128x128xf32>
    %cst_11 = arith.constant 0.000000e+00 : f32
    %26 = vector.broadcast %cst_11 : f32 to vector<128x128xf32>
    %27 = arith.maximumf %25, %26 : vector<128x128xf32>
    %c0_12 = arith.constant 0 : index
    %c0_13 = arith.constant 0 : index
    %28 = vector.load %arg4[%c0_12, %c0_13] : memref<128x128xf32, #tpu.memory_space<vmem>>, vector<128x128xf32>
    %cst_14 = arith.constant dense<0.000000e+00> : vector<128x128xf32>
    %29 = tpu.matmul %27, %28, %cst_14 {dimension_numbers = #tpu.dot_dimension_numbers<[1], [0], [0], [1], [0, 0, 1, 1], [], []>} : vector<128x128xf32>, vector<128x128xf32>, vector<128x128xf32> -> vector<128x128xf32>
    %c0_15 = arith.constant 0 : index
    %c0_16 = arith.constant 0 : index
    %30 = vector.load %arg5[%c0_15, %c0_16] : memref<1x128xf32, #tpu.memory_space<vmem>>, vector<1x128xf32>
    %31 = vector.broadcast %30 : vector<1x128xf32> to vector<128x128xf32>
    %32 = arith.addf %29, %31 : vector<128x128xf32>
    %cst_17 = arith.constant dense<0.000000e+00> : vector<128xf32>
    %33 = vector.multi_reduction <add>, %32, %cst_17 [1] : vector<128x128xf32> to vector<128xf32>
    %34 = vector.shape_cast %33 : vector<128xf32> to vector<128x1xf32>
    %35 = arith.mulf %32, %32 : vector<128x128xf32>
    %cst_18 = arith.constant dense<0.000000e+00> : vector<128xf32>
    %36 = vector.multi_reduction <add>, %35, %cst_18 [1] : vector<128x128xf32> to vector<128xf32>
    %37 = vector.shape_cast %36 : vector<128xf32> to vector<128x1xf32>
    %cst_19 = arith.constant 3.125000e-02 : f32
    %38 = vector.broadcast %cst_19 : f32 to vector<128x1xf32>
    %39 = arith.mulf %34, %38 : vector<128x1xf32>
    %cst_20 = arith.constant 3.125000e-02 : f32
    %40 = vector.broadcast %cst_20 : f32 to vector<128x1xf32>
    %41 = arith.mulf %37, %40 : vector<128x1xf32>
    %42 = arith.mulf %39, %39 : vector<128x1xf32>
    %43 = arith.subf %41, %42 : vector<128x1xf32>
    %cst_21 = arith.constant 0.000000e+00 : f32
    %44 = vector.broadcast %cst_21 : f32 to vector<128x1xf32>
    %45 = arith.maximumf %43, %44 : vector<128x1xf32>
    %46 = vector.broadcast %39 : vector<128x1xf32> to vector<128x128xf32>
    %47 = arith.subf %32, %46 : vector<128x128xf32>
    %cst_22 = arith.constant 9.99999974E-6 : f32
    %48 = vector.broadcast %cst_22 : f32 to vector<128x1xf32>
    %49 = arith.addf %45, %48 : vector<128x1xf32>
    %50 = math.rsqrt %49 : vector<128x1xf32>
    %51 = vector.broadcast %50 : vector<128x1xf32> to vector<128x128xf32>
    %52 = arith.mulf %47, %51 : vector<128x128xf32>
    %cst_23 = arith.constant 0.000000e+00 : f32
    %53 = vector.broadcast %cst_23 : f32 to vector<128x128xf32>
    %54 = arith.maximumf %52, %53 : vector<128x128xf32>
    %c0_24 = arith.constant 0 : index
    %c0_25 = arith.constant 0 : index
    %55 = vector.load %arg6[%c0_24, %c0_25] : memref<128x128xf32, #tpu.memory_space<vmem>>, vector<128x128xf32>
    %cst_26 = arith.constant dense<0.000000e+00> : vector<128x128xf32>
    %56 = tpu.matmul %54, %55, %cst_26 {dimension_numbers = #tpu.dot_dimension_numbers<[1], [0], [0], [1], [0, 0, 1, 1], [], []>} : vector<128x128xf32>, vector<128x128xf32>, vector<128x128xf32> -> vector<128x128xf32>
    %c0_27 = arith.constant 0 : index
    %c0_28 = arith.constant 0 : index
    %57 = memref.load %arg7[%c0_27, %c0_28] : memref<1x1xf32, #tpu.memory_space<smem>>
    %58 = vector.broadcast %57 : f32 to vector<128x128xf32>
    %59 = arith.addf %56, %58 : vector<128x128xf32>
    %c0_29 = arith.constant 0 : index
    %c0_30 = arith.constant 0 : index
    %60 = vector.load %arg8[%c0_29, %c0_30] : memref<128x128xf32, #tpu.memory_space<vmem>>, vector<128x128xf32>
    tpu.vector_store %arg8[%c0_29, %c0_30], %59 {strides = array<i32>} : memref<128x128xf32, #tpu.memory_space<vmem>>, vector<128x128xf32>,
    return
  }
  func.func @transform_0(%arg0: i32) -> (i32, i32) {
    %c0_i32 = arith.constant 0 : i32
    %c0_i32_0 = arith.constant 0 : i32
    return %arg0, %c0_i32 : i32, i32
  }
  func.func @transform_1(%arg0: i32) -> (i32, i32) {
    %c0_i32 = arith.constant 0 : i32
    %c0_i32_0 = arith.constant 0 : i32
    %c0_i32_1 = arith.constant 0 : i32
    return %c0_i32, %c0_i32_0 : i32, i32
  }
  func.func @transform_2(%arg0: i32) -> (i32, i32) {
    %c0_i32 = arith.constant 0 : i32
    %c0_i32_0 = arith.constant 0 : i32
    %c0_i32_1 = arith.constant 0 : i32
    return %c0_i32, %c0_i32_0 : i32, i32
  }
  func.func @transform_3(%arg0: i32) -> (i32, i32) {
    %c0_i32 = arith.constant 0 : i32
    %c0_i32_0 = arith.constant 0 : i32
    %c0_i32_1 = arith.constant 0 : i32
    return %c0_i32, %c0_i32_0 : i32, i32
  }
  func.func @transform_4(%arg0: i32) -> (i32, i32) {
    %c0_i32 = arith.constant 0 : i32
    %c0_i32_0 = arith.constant 0 : i32
    %c0_i32_1 = arith.constant 0 : i32
    return %c0_i32, %c0_i32_0 : i32, i32
  }
  func.func @transform_5(%arg0: i32) -> (i32, i32) {
    %c0_i32 = arith.constant 0 : i32
    %c0_i32_0 = arith.constant 0 : i32
    %c0_i32_1 = arith.constant 0 : i32
    return %c0_i32, %c0_i32_0 : i32, i32
  }
  func.func @transform_6(%arg0: i32) -> (i32, i32) {
    %c0_i32 = arith.constant 0 : i32
    %c0_i32_0 = arith.constant 0 : i32
    %c0_i32_1 = arith.constant 0 : i32
    return %c0_i32, %c0_i32_0 : i32, i32
  }
  func.func @transform_7(%arg0: i32) -> (i32, i32) {
    %c0_i32 = arith.constant 0 : i32
    %c0_i32_0 = arith.constant 0 : i32
    return %arg0, %c0_i32 : i32, i32
  }
}

</mosaic_0001>

<bundles_post_ra>
// kernel: tpu_custom_call.1
= control target key start
LH: loop header
LB: loop body
LE: loop exit
PB: predicated region body
PF: predicated region fallthrough
CT: control target
= control target key end

     0   :  { %13 = vsyncpa [#allocation4], 0  ;;  %s1961_s0 = inlined_call_operand.vmem [shape: f32[128,24], index: 0, kind: input, shape index: {}]   ;;  %s1962_s1 = inlined_call_operand.vmem [shape: f32[24,128], index: 1, kind: input, shape index: {}]   ;;  %s1963_s2 = inlined_call_operand.vmem [shape: f32[1,128], index: 2, kind: input, shape index: {}]   ;;  %s1964_s3 = inlined_call_operand.vmem [shape: f32[128,128], index: 3, kind: input, shape index: {}]   ;;  %s1965_s4 = inlined_call_operand.vmem [shape: f32[1,128], index: 4, kind: input, shape index: {}]   ;;  %s1966_s5 = inlined_call_operand.hbm [shape: f32[128,128], index: 5, kind: input, shape index: {}]   ;;  %s1967_s6 = inlined_call_operand.<no memory space> [shape: f32[1,1], index: 6, kind: input, shape index: {}]   ;;  %s1968_s7 = inlined_call_operand.hbm [shape: f32[128,128], index: 7, kind: output, shape index: {}]  }
   0x1   :  { %14 = vsyncpa [#allocation5], 0  ;;  %s29_s26 = sshll.u32 %s1966_s5, 4  ;;  %s1322_s27 = smov [#allocation3]   ;;  %s30_s26 = int_to_ptr.hbm [resolvable:$true] %s29_s26 }
   0x2   :  { %s31_s28 = sshll.u32 %s1322_s27, 4  ;;  %s1323_s29 = smov 128   ;;  %s32_s28 = int_to_ptr.vmem [resolvable:$true] %s31_s28 }
   0x3   :  { %s1324_s30 = smov 8  }
   0x4   :  { %37 = dma.hbm_to_vmem [thread:$0]  %s30_s26, 2048, %s32_s28, [#allocation4], %s1323_s29, %s1323_s29, %s1324_s30  }
   0x5   :  { %1318 = dma.done.wait [#allocation4], 2048  }
   0x6   :  { %1319 = vsyncadd [#allocation4], 4294965248  ;;  %v62_v0 = vld [vmem:[%s1962_s1 + $0x10] sm:$0xff]  ;;  %v61_v1 = vld [vmem:[%s1962_s1 + $0x8] sm:$0xff]  ;;  %vm67_vm0 = vcmask 195584   ;;  %s1139_s5 = sshll.u32 %s1968_s7, 4  ;;  %s1140_s5 = int_to_ptr.hbm [resolvable:$true] %s1139_s5 }
   0x7   :  { %129 = vmatpush.msra.mxu0 %v62_v0  ;;  %v60_v2 = vld [vmem:[%s1962_s1] sm:$0xff]  ;;  %v45_v4 = vld [vmem:[%s1961_s0 + $0x8] sm:$0xff]  ;;  %v46_v5 = vld [vmem:[%s1961_s0 + $0x10] sm:$0xff] }
   0x8   :  { %v44_v3 = vld [vmem:[%s1961_s0] sm:$0xff]  ;;  %v47_v6 = vld [vmem:[%s1961_s0 + $0x18] sm:$0xff]  ;;  %v49_v8 = vld [vmem:[%s1961_s0 + $0x28] sm:$0xff] }
   0x9   :  { %130 = vmatpush.msra.mxu0 %v61_v1  ;;  %v48_v7 = vld [vmem:[%s1961_s0 + $0x20] sm:$0xff]  ;;  %v50_v9 = vld [vmem:[%s1961_s0 + $0x30] sm:$0xff]  ;;  %v51_v10 = vld [vmem:[%s1961_s0 + $0x38] sm:$0xff] }
   0xa   :  { %v52_v11 = vld [vmem:[%s1961_s0 + $0x40] sm:$0xff]  ;;  %v53_v12 = vld [vmem:[%s1961_s0 + $0x48] sm:$0xff]  ;;  %v54_v13 = vld [vmem:[%s1961_s0 + $0x50] sm:$0xff] }
   0xb   :  { %131 = vmatpush.msra.mxu0 %v60_v2  ;;  %v55_v14 = vld [vmem:[%s1961_s0 + $0x58] sm:$0xff]  ;;  %v56_v15 = vld [vmem:[%s1961_s0 + $0x60] sm:$0xff]  ;;  %v57_v16 = vld [vmem:[%s1961_s0 + $0x68] sm:$0xff] }
   0xc   :  { %1152 = vmatmul.msk.f32.vlgmr.msra.gmra.mxu0 %vm67_vm0, %v44_v3  ;;  %v58_v17 = vld [vmem:[%s1961_s0 + $0x70] sm:$0xff]  ;;  %v59_v18 = vld [vmem:[%s1961_s0 + $0x78] sm:$0xff]  ;;  %v1448_v19 = vld [vmem:[%s1963_s2] ss:$0 sm:$0xff] }
   0xd   :  { %v580_v51 = vld [vmem:[%s1964_s3 + $0x78] sm:$0xff]  ;;  %v579_v52 = vld [vmem:[%s1964_s3 + $0x70] sm:$0xff]  ;;  %v578_v55 = vld [vmem:[%s1964_s3 + $0x68] sm:$0xff] }
   0xe   :  { %585 = vmatpush.msra.mxu1 %v580_v51  ;;  %1168 = vmatpush.msra.mxu3 %v580_v51  ;;  %v577_v57 = vld [vmem:[%s1964_s3 + $0x60] sm:$0xff]  ;;  %v576_v58 = vld [vmem:[%s1964_s3 + $0x58] sm:$0xff]  ;;  %v575_v59 = vld [vmem:[%s1964_s3 + $0x50] sm:$0xff] }
   0xf   :  { %v574_v62 = vld [vmem:[%s1964_s3 + $0x48] sm:$0xff]  ;;  %v573_v0 = vld [vmem:[%s1964_s3 + $0x40] sm:$0xff]  ;;  %v572_v1 = vld [vmem:[%s1964_s3 + $0x38] sm:$0xff] }
  0x10   :  { %586 = vmatpush.msra.mxu1 %v579_v52  ;;  %1169 = vmatpush.msra.mxu3 %v579_v52  ;;  %v571_v2 = vld [vmem:[%s1964_s3 + $0x30] sm:$0xff] }
  0x12   :  { %587 = vmatpush.msra.mxu1 %v578_v55  ;;  %1170 = vmatpush.msra.mxu3 %v578_v55 }
  0x14   :  { %1153 = vmatmul.msk.f32.gmra.mxu0 %vm67_vm0, %v45_v4  ;;  %588 = vmatpush.msra.mxu1 %v577_v57 }
  0x15   :  { %1171 = vmatpush.msra.mxu3 %v577_v57 }
  0x16   :  { %589 = vmatpush.msra.mxu1 %v576_v58 }
  0x17   :  { %1172 = vmatpush.msra.mxu3 %v576_v58 }
  0x18   :  { %590 = vmatpush.msra.mxu1 %v575_v59 }
  0x19   :  { %1173 = vmatpush.msra.mxu3 %v575_v59 }
  0x1a   :  { %591 = vmatpush.msra.mxu1 %v574_v62 }
  0x1b   :  { %1174 = vmatpush.msra.mxu3 %v574_v62 }
  0x1c   :  { %1154 = vmatmul.msk.f32.gmra.mxu0 %vm67_vm0, %v46_v5  ;;  %592 = vmatpush.msra.mxu1 %v573_v0  ;;  %v570_v5 = vld [vmem:[%s1964_s3 + $0x28] sm:$0xff] }
  0x1d   :  { %1175 = vmatpush.msra.mxu3 %v573_v0 }
  0x1e   :  { %593 = vmatpush.msra.mxu1 %v572_v1 }
  0x1f   :  { %1176 = vmatpush.msra.mxu3 %v572_v1 }
  0x20   :  { %594 = vmatpush.msra.mxu1 %v571_v2 }
  0x21   :  { %1177 = vmatpush.msra.mxu3 %v571_v2 }
  0x22   :  { %595 = vmatpush.msra.mxu1 %v570_v5 }
  0x23   :  { %1178 = vmatpush.msra.mxu3 %v570_v5 }
  0x24   :  { %1155 = vmatmul.msk.f32.gmra.mxu0 %vm67_vm0, %v47_v6 }
  0x2c   :  { %1156 = vmatmul.msk.f32.gmra.mxu0 %vm67_vm0, %v48_v7 }
  0x34   :  { %1157 = vmatmul.msk.f32.gmra.mxu0 %vm67_vm0, %v49_v8  ;;  %v569_v8 = vld [vmem:[%s1964_s3 + $0x20] sm:$0xff] }
  0x35   :  { %596 = vmatpush.msra.mxu1 %v569_v8  ;;  %1179 = vmatpush.msra.mxu3 %v569_v8 }
  0x3c   :  { %1158 = vmatmul.msk.f32.gmra.mxu0 %vm67_vm0, %v50_v9  ;;  %v568_v9 = vld [vmem:[%s1964_s3 + $0x18] sm:$0xff] }
  0x3d   :  { %597 = vmatpush.msra.mxu1 %v568_v9  ;;  %1180 = vmatpush.msra.mxu3 %v568_v9 }
  0x44   :  { %1159 = vmatmul.msk.f32.gmra.mxu0 %vm67_vm0, %v51_v10 }
  0x4c   :  { %1160 = vmatmul.msk.f32.gmra.mxu0 %vm67_vm0, %v52_v11 }
  0x54   :  { %1161 = vmatmul.msk.f32.gmra.mxu0 %vm67_vm0, %v53_v12  ;;  %v567_v12 = vld [vmem:[%s1964_s3 + $0x10] sm:$0xff] }
  0x55   :  { %598 = vmatpush.msra.mxu1 %v567_v12  ;;  %1181 = vmatpush.msra.mxu3 %v567_v12 }
  0x5c   :  { %1162 = vmatmul.msk.f32.gmra.mxu0 %vm67_vm0, %v54_v13 }
  0x64   :  { %1163 = vmatmul.msk.f32.gmra.mxu0 %vm67_vm0, %v55_v14 }
  0x6c   :  { %1164 = vmatmul.msk.f32.gmra.mxu0 %vm67_vm0, %v56_v15  ;;  %v566_v15 = vld [vmem:[%s1964_s3 + $0x8] sm:$0xff] }
  0x6d   :  { %599 = vmatpush.msra.mxu1 %v566_v15  ;;  %1182 = vmatpush.msra.mxu3 %v566_v15 }
  0x74   :  { %1165 = vmatmul.msk.f32.gmra.mxu0 %vm67_vm0, %v57_v16 }
  0x7c   :  { %1166 = vmatmul.msk.f32.gmra.mxu0 %vm67_vm0, %v58_v17 }
  0x84   :  { %1167 = vmatmul.msk.f32.gmra.mxu0 %vm67_vm0, %v59_v18  ;;  %v565_v18 = vld [vmem:[%s1964_s3] sm:$0xff] }
  0x85   :  { %600 = vmatpush.msra.mxu1 %v565_v18  ;;  %1183 = vmatpush.msra.mxu3 %v565_v18 }
  0x89   :  { %v133_v20 = vpop.f32.mrf.mxu0 }
  0x8a   :  { %v1451_v21 = vadd.f32 %v1448_v19, %v133_v20 }
  0x8c   :  { %181 = vadd.xlane.f32.xlu0 %v1451_v21  ;;  %v213_v24 = vmul.f32 %v1451_v21, %v1451_v21 }
  0x91   :  { %v136_v22 = vpop.f32.mrf.mxu0 }
  0x92   :  { %v1455_v23 = vadd.f32 %v1448_v19, %v136_v22 }
  0x94   :  { %183 = vadd.xlane.f32.xlu1 %v1455_v23  ;;  %229 = vadd.xlane.f32.xlu0 %v213_v24  ;;  %v214_v27 = vmul.f32 %v1455_v23, %v1455_v23 }
  0x99   :  { %v139_v25 = vpop.f32.mrf.mxu0 }
  0x9a   :  { %v1461_v26 = vadd.f32 %v1448_v19, %v139_v25 }
  0x9c   :  { %185 = vadd.xlane.f32.xlu2 %v1461_v26  ;;  %231 = vadd.xlane.f32.xlu1 %v214_v27  ;;  %v215_v30 = vmul.f32 %v1461_v26, %v1461_v26 }
  0xa1   :  { %v142_v28 = vpop.f32.mrf.mxu0 }
  0xa2   :  { %v1467_v29 = vadd.f32 %v1448_v19, %v142_v28 }
  0xa4   :  { %233 = vadd.xlane.f32.xlu2 %v215_v30  ;;  %187 = vadd.xlane.f32.xlu0 %v1467_v29  ;;  %v216_v31 = vmul.f32 %v1467_v29, %v1467_v29 }
  0xa6   :  { %235 = vadd.xlane.f32.xlu1 %v216_v31 }
  0xa9   :  { %v145_v32 = vpop.f32.mrf.mxu0 }
  0xaa   :  { %v1475_v33 = vadd.f32 %v1448_v19, %v145_v32 }
  0xac   :  { %189 = vadd.xlane.f32.xlu2 %v1475_v33  ;;  %v217_v34 = vmul.f32 %v1475_v33, %v1475_v33 }
  0xae   :  { %237 = vadd.xlane.f32.xlu0 %v217_v34 }
  0xb1   :  { %v148_v35 = vpop.f32.mrf.mxu0 }
  0xb2   :  { %v1481_v36 = vadd.f32 %v1448_v19, %v148_v35 }
  0xb4   :  { %191 = vadd.xlane.f32.xlu1 %v1481_v36  ;;  %v218_v37 = vmul.f32 %v1481_v36, %v1481_v36 }
  0xb6   :  { %239 = vadd.xlane.f32.xlu2 %v218_v37 }
  0xb9   :  { %v151_v38 = vpop.f32.mrf.mxu0 }
  0xba   :  { %v1487_v39 = vadd.f32 %v1448_v19, %v151_v38 }
  0xbc   :  { %193 = vadd.xlane.f32.xlu0 %v1487_v39  ;;  %v219_v40 = vmul.f32 %v1487_v39, %v1487_v39 }
  0xbe   :  { %241 = vadd.xlane.f32.xlu1 %v219_v40 }
  0xc1   :  { %v154_v41 = vpop.f32.mrf.mxu0 }
  0xc2   :  { %v1493_v42 = vadd.f32 %v1448_v19, %v154_v41 }
  0xc4   :  { %195 = vadd.xlane.f32.xlu2 %v1493_v42  ;;  %v220_v43 = vmul.f32 %v1493_v42, %v1493_v42 }
  0xc6   :  { %243 = vadd.xlane.f32.xlu1 %v220_v43 }
  0xc9   :  { %v157_v44 = vpop.f32.mrf.mxu0 }
  0xca   :  { %v1499_v45 = vadd.f32 %v1448_v19, %v157_v44 }
  0xcc   :  { %197 = vadd.xlane.f32.xlu0 %v1499_v45  ;;  %v221_v46 = vmul.f32 %v1499_v45, %v1499_v45 }
  0xce   :  { %245 = vadd.xlane.f32.xlu2 %v221_v46 }
  0xd1   :  { %v160_v47 = vpop.f32.mrf.mxu0 }
  0xd2   :  { %v1505_v48 = vadd.f32 %v1448_v19, %v160_v47 }
  0xd4   :  { %199 = vadd.xlane.f32.xlu1 %v1505_v48  ;;  %v222_v7 = vmul.f32 %v1505_v48, %v1505_v48 }
  0xd9   :  { %v163_v49 = vpop.f32.mrf.mxu0 }
  0xda   :  { %v1570_v11 = vadd.f32 %v1448_v19, %v163_v49 }
  0xdc   :  { %v223_v17 = vmul.f32 %v1570_v11, %v1570_v11 }
  0xe1   :  { %v1508_v50 = vpop.f32.mrf.mxu0 }
  0xe2   :  { %v1592_v24 = vadd.f32 %v1448_v19, %v1508_v50 }
  0xe4   :  { %v224_v34 = vmul.f32 %v1592_v24, %v1592_v24 }
  0xe9   :  { %v169_v53 = vpop.f32.mrf.mxu0 }
  0xea   :  { %v1517_v54 = vadd.f32 %v1448_v19, %v169_v53 }
  0xec   :  { %205 = vadd.xlane.f32.xlu0 %v1517_v54  ;;  %v225_v56 = vmul.f32 %v1517_v54, %v1517_v54 }
  0xee   :  { %253 = vadd.xlane.f32.xlu2 %v225_v56 }
  0xf1   :  { %v172_v60 = vpop.f32.mrf.mxu0 }
  0xf2   :  { %v1535_v61 = vadd.f32 %v1448_v19, %v172_v60 }
  0xf4   :  { %207 = vadd.xlane.f32.xlu1 %v1535_v61  ;;  %v226_v63 = vmul.f32 %v1535_v61, %v1535_v61 }
  0xf6   :  { %255 = vadd.xlane.f32.xlu0 %v226_v63 }
  0xf9   :  { %v175_v3 = vpop.f32.mrf.mxu0 }
  0xfa   :  { %v1553_v4 = vadd.f32 %v1448_v19, %v175_v3 }
  0xfc   :  { %209 = vadd.xlane.f32.xlu2 %v1553_v4  ;;  %v227_v6 = vmul.f32 %v1553_v4, %v1553_v4 }
  0xfe   :  { %257 = vadd.xlane.f32.xlu1 %v227_v6  ;;  %247 = vadd.xlane.f32.xlu0 %v222_v7 }
  0xff   :  { %v182_v10 = vpop.xlane.xlu0 %181 }
 0x100   :  { %v1581_v16 = vmul.f32 0.03125, %v182_v10 }
 0x101   :  { %v178_v13 = vpop.f32.mrf.mxu0 }
 0x102   :  { %v1576_v14 = vadd.f32 %v1448_v19, %v178_v13  ;;  %v293_v25 = vmul.f32 %v1581_v16, %v1581_v16  ;;  %v341_v12 = vsub.f32 %v1451_v21, %v1581_v16 }
 0x104   :  { %201 = vadd.xlane.f32.xlu2 %v1570_v11  ;;  %v228_v28 = vmul.f32 %v1576_v14, %v1576_v14 }
 0x106   :  { %249 = vadd.xlane.f32.xlu1 %v223_v17  ;;  %211 = vadd.xlane.f32.xlu0 %v1576_v14 }
 0x107   :  { %v184_v20 = vpop.xlane.xlu1 %183  ;;  %v230_v22 = vpop.xlane.xlu0 %229 }
 0x108   :  { %v277_v27 = vmul.f32 0.03125, %v230_v22  ;;  %v1598_v31 = vmul.f32 0.03125, %v184_v20 }
 0x10a   :  { %v309_v30 = vsub.f32 %v277_v27, %v293_v25  ;;  %v294_v38 = vmul.f32 %v1598_v31, %v1598_v31 }
 0x10c   :  { %v325_v32 = vmax.f32 %v309_v30, 0.0  ;;  %259 = vadd.xlane.f32.xlu2 %v228_v28 }
 0x10e   :  { %v357_v35 = vadd.f32 1e-05, %v325_v32  ;;  %251 = vadd.xlane.f32.xlu1 %v224_v34  ;;  %203 = vadd.xlane.f32.xlu0 %v1592_v24 }
 0x10f   :  { %v186_v19 = vpop.xlane.xlu2 %185  ;;  %v232_v37 = vpop.xlane.xlu1 %231 }
 0x110   :  { %1206 = vrsqrt.f32 %v357_v35  ;;  %v278_v40 = vmul.f32 0.03125, %v232_v37  ;;  %v1605_v43 = vmul.f32 0.03125, %v186_v19  ;;  %vm379_vm2 = vweird.f32 %v357_v35 }
 0x112   :  { %v310_v41 = vsub.f32 %v278_v40, %v294_v38  ;;  %v295_v52 = vmul.f32 %v1605_v43, %v1605_v43  ;;  %v342_v40 = vsub.f32 %v1455_v23, %v1598_v31 }
 0x114   :  { %v326_v44 = vmax.f32 %v310_v41, 0.0 }
 0x116   :  { %v1207_v46 = vpop.eup %1206  ;;  %v358_v47 = vadd.f32 1e-05, %v326_v44 }
 0x117   :  { %v374_v49 = vmul.f32 %v1207_v46, %v357_v35  ;;  %v234_v50 = vpop.xlane.xlu2 %233  ;;  %v188_v51 = vpop.xlane.xlu0 %187  ;;  %vm380_vm1 = vweird.f32 %v1207_v46 }
 0x118   :  { %1208 = vrsqrt.f32 %v358_v47  ;;  %v279_v53 = vmul.f32 0.03125, %v234_v50  ;;  %v1609_v55 = vmul.f32 0.03125, %v188_v51  ;;  %vm381_vm3 = vmor %vm379_vm2, %vm380_vm1  ;;  %vm389_vm5 = vweird.f32 %v358_v47 }
 0x119   :  { %v375_v56 = vmul.f32 %v1207_v46, %v374_v49  ;;  %v236_v57 = vpop.xlane.xlu1 %235 }
 0x11a   :  { %v311_v58 = vsub.f32 %v279_v53, %v295_v52  ;;  %v296_v59 = vmul.f32 %v1609_v55, %v1609_v55  ;;  %v280_v60 = vmul.f32 0.03125, %v236_v57 }
 0x11b   :  { %v376_v62 = vmul.f32 0.5, %v375_v56 }
 0x11c   :  { %v327_v63 = vmax.f32 %v311_v58, 0.0  ;;  %v312_v0 = vsub.f32 %v280_v60, %v296_v59 }
 0x11d   :  { %v377_v1 = vsub.f32 1.5, %v376_v62 }
 0x11e   :  { %v1209_v2 = vpop.eup %1208  ;;  %v359_v3 = vadd.f32 1e-05, %v327_v63  ;;  %v328_v5 = vmax.f32 %v312_v0, 0.0 }
 0x11f   :  { %v384_v6 = vmul.f32 %v1209_v2, %v358_v47  ;;  %v190_v7 = vpop.xlane.xlu2 %189  ;;  %v378_v8 = vmul.f32 %v1207_v46, %v377_v1  ;;  %vm390_vm4 = vweird.f32 %v1209_v2 }
 0x120   :  { %1210 = vrsqrt.f32 %v359_v3  ;;  %v1613_v9 = vadd.f32 1e-05, %v328_v5  ;;  %v1615_v10 = vmul.f32 0.03125, %v190_v7  ;;  %vm391_vm6 = vmor %vm389_vm5, %vm390_vm4  ;;  %vm399_vm8 = vweird.f32 %v359_v3 }
 0x121   :  { %v385_v13 = vmul.f32 %v1209_v2, %v384_v6  ;;  %v238_v15 = vpop.xlane.xlu0 %237  ;;  %v382_v17 = vsel %vm381_vm3, %v1207_v46, %v378_v8 }
 0x122   :  { %1212 = vrsqrt.f32 %v1613_v9  ;;  %v297_v18 = vmul.f32 %v1615_v10, %v1615_v10  ;;  %v281_v20 = vmul.f32 0.03125, %v238_v15  ;;  %v533_v22 = vmul.f32 %v382_v17, %v341_v12 }
 0x123   :  { %v386_v25 = vmul.f32 0.5, %v385_v13  ;;  %vm409_vm11 = vweird.f32 %v1613_v9 }
 0x124   :  { %v313_v27 = vsub.f32 %v281_v20, %v297_v18  ;;  %v549_v28 = vmax.f32 %v533_v22, 0.0  ;;  %v344_v22 = vsub.f32 %v1467_v29, %v1609_v55 }
 0x125   :  { %v387_v30 = vsub.f32 1.5, %v386_v25 }
 0x126   :  { %v1211_v32 = vpop.eup %1210  ;;  %v329_v34 = vmax.f32 %v313_v27, 0.0  ;;  %601 = vmatmul.f32.vlgmr.msra.gmra.mxu1 %v549_v28 }
 0x127   :  { %v394_v35 = vmul.f32 %v1211_v32, %v359_v3  ;;  %v192_v21 = vpop.xlane.xlu1 %191  ;;  %v388_v16 = vmul.f32 %v1209_v2, %v387_v30  ;;  %vm400_vm7 = vweird.f32 %v1211_v32 }
 0x128   :  { %v1213_v19 = vpop.eup %1212  ;;  %v1622_v37 = vadd.f32 1e-05, %v329_v34  ;;  %v1624_v38 = vmul.f32 0.03125, %v192_v21  ;;  %vm401_vm9 = vmor %vm399_vm8, %vm400_vm7 }
 0x129   :  { %v395_v41 = vmul.f32 %v1211_v32, %v394_v35  ;;  %v404_v44 = vmul.f32 %v1213_v19, %v1613_v9  ;;  %v240_v46 = vpop.xlane.xlu2 %239  ;;  %v392_v49 = vsel %vm391_vm6, %v1209_v2, %v388_v16  ;;  %v343_v2 = vsub.f32 %v1461_v26, %v1605_v43 }
 0x12a   :  { %1214 = vrsqrt.f32 %v1622_v37  ;;  %v298_v50 = vmul.f32 %v1624_v38, %v1624_v38  ;;  %v282_v47 = vmul.f32 0.03125, %v240_v46  ;;  %v534_v52 = vmul.f32 %v392_v49, %v342_v40 }
 0x12b   :  { %v405_v51 = vmul.f32 %v1213_v19, %v404_v44  ;;  %v396_v53 = vmul.f32 0.5, %v395_v41  ;;  %vm410_vm10 = vweird.f32 %v1213_v19  ;;  %vm419_vm14 = vweird.f32 %v1622_v37 }
 0x12c   :  { %v314_v56 = vsub.f32 %v282_v47, %v298_v50  ;;  %v550_v57 = vmax.f32 %v534_v52, 0.0  ;;  %vm411_vm12 = vmor %vm409_vm11, %vm410_vm10  ;;  %v345_v49 = vsub.f32 %v1475_v33, %v1615_v10 }
 0x12d   :  { %v397_v58 = vsub.f32 1.5, %v396_v53  ;;  %v406_v59 = vmul.f32 0.5, %v405_v51 }
 0x12e   :  { %v330_v23 = vmax.f32 %v314_v56, 0.0  ;;  %604 = vmatmul.f32.gmra.mxu1 %v550_v57 }
 0x12f   :  { %v194_v31 = vpop.xlane.xlu0 %193  ;;  %v398_v60 = vmul.f32 %v1211_v32, %v397_v58  ;;  %v407_v62 = vsub.f32 1.5, %v406_v59 }
 0x130   :  { %v1215_v63 = vpop.eup %1214  ;;  %v1632_v0 = vadd.f32 1e-05, %v330_v23  ;;  %v1634_v1 = vmul.f32 0.03125, %v194_v31 }
 0x131   :  { %v414_v5 = vmul.f32 %v1215_v63, %v1622_v37  ;;  %v242_v6 = vpop.xlane.xlu1 %241  ;;  %v402_v7 = vsel %vm401_vm9, %v1211_v32, %v398_v60  ;;  %v408_v12 = vmul.f32 %v1213_v19, %v407_v62  ;;  %vm420_vm13 = vweird.f32 %v1215_v63 }
 0x132   :  { %1216 = vrsqrt.f32 %v1632_v0  ;;  %v299_v3 = vmul.f32 %v1634_v1, %v1634_v1  ;;  %v283_v8 = vmul.f32 0.03125, %v242_v6  ;;  %v535_v15 = vmul.f32 %v402_v7, %v343_v2  ;;  %vm421_vm15 = vmor %vm419_vm14, %vm420_vm13 }
 0x133   :  { %v415_v13 = vmul.f32 %v1215_v63, %v414_v5  ;;  %v412_v20 = vsel %vm411_vm12, %v1213_v19, %v408_v12  ;;  %vm429_vm1 = vweird.f32 %v1632_v0  ;;  %v346_v2 = vsub.f32 %v1481_v36, %v1624_v38 }
 0x134   :  { %v315_v17 = vsub.f32 %v283_v8, %v299_v3  ;;  %v551_v18 = vmax.f32 %v535_v15, 0.0  ;;  %v536_v21 = vmul.f32 %v412_v20, %v344_v22 }
 0x135   :  { %v416_v26 = vmul.f32 0.5, %v415_v13 }
 0x136   :  { %v331_v43 = vmax.f32 %v315_v17, 0.0  ;;  %607 = vmatmul.f32.gmra.mxu1 %v551_v18  ;;  %v552_v55 = vmax.f32 %v536_v21, 0.0  ;;  %v347_v18 = vsub.f32 %v1487_v39, %v1634_v1 }
 0x137   :  { %v196_v25 = vpop.xlane.xlu2 %195  ;;  %v417_v27 = vsub.f32 1.5, %v416_v26 }
 0x138   :  { %v1217_v28 = vpop.eup %1216  ;;  %v363_v30 = vadd.f32 1e-05, %v331_v43  ;;  %v1645_v32 = vmul.f32 0.03125, %v196_v25 }
 0x139   :  { %v424_v34 = vmul.f32 %v1217_v28, %v1632_v0  ;;  %v244_v35 = vpop.xlane.xlu1 %243  ;;  %v418_v19 = vmul.f32 %v1215_v63, %v417_v27  ;;  %vm430_vm0 = vweird.f32 %v1217_v28 }
 0x13a   :  { %1218 = vrsqrt.f32 %v363_v30  ;;  %v300_v9 = vmul.f32 %v1645_v32, %v1645_v32  ;;  %v284_v16 = vmul.f32 0.03125, %v244_v35  ;;  %vm431_vm2 = vmor %vm429_vm1, %vm430_vm0  ;;  %vm439_vm4 = vweird.f32 %v363_v30 }
 0x13b   :  { %v425_v40 = vmul.f32 %v1217_v28, %v424_v34  ;;  %v422_v46 = vsel %vm421_vm15, %v1215_v63, %v418_v19 }
 0x13c   :  { %v316_v29 = vsub.f32 %v284_v16, %v300_v9  ;;  %v537_v58 = vmul.f32 %v422_v46, %v345_v49 }
 0x13d   :  { %v426_v41 = vmul.f32 0.5, %v425_v40 }
 0x13e   :  { %v332_v44 = vmax.f32 %v316_v29, 0.0  ;;  %610 = vmatmul.f32.gmra.mxu1 %v552_v55  ;;  %v553_v33 = vmax.f32 %v537_v58, 0.0 }
 0x13f   :  { %v198_v50 = vpop.xlane.xlu0 %197  ;;  %v427_v47 = vsub.f32 1.5, %v426_v41 }
 0x140   :  { %v1219_v51 = vpop.eup %1218  ;;  %v364_v52 = vadd.f32 1e-05, %v332_v44  ;;  %v1653_v53 = vmul.f32 0.03125, %v198_v50 }
 0x141   :  { %v434_v56 = vmul.f32 %v1219_v51, %v363_v30  ;;  %v246_v57 = vpop.xlane.xlu2 %245  ;;  %v428_v23 = vmul.f32 %v1217_v28, %v427_v47  ;;  %vm440_vm3 = vweird.f32 %v1219_v51  ;;  %v348_v30 = vsub.f32 %v1493_v42, %v1645_v32 }
 0x142   :  { %1220 = vrsqrt.f32 %v364_v52  ;;  %v301_v37 = vmul.f32 %v1653_v53, %v1653_v53  ;;  %v285_v59 = vmul.f32 0.03125, %v246_v57  ;;  %vm441_vm5 = vmor %vm439_vm4, %vm440_vm3  ;;  %vm449_vm7 = vweird.f32 %v364_v52 }
 0x143   :  { %v435_v31 = vmul.f32 %v1219_v51, %v434_v56  ;;  %v432_v63 = vsel %vm431_vm2, %v1217_v28, %v428_v23  ;;  %v349_v9 = vsub.f32 %v1499_v45, %v1653_v53 }
 0x144   :  { %v317_v60 = vsub.f32 %v285_v59, %v301_v37  ;;  %v538_v8 = vmul.f32 %v432_v63, %v346_v2 }
 0x145   :  { %v436_v10 = vmul.f32 0.5, %v435_v31 }
 0x146   :  { %v333_v62 = vmax.f32 %v317_v60, 0.0  ;;  %613 = vmatmul.f32.gmra.mxu1 %v553_v33  ;;  %v554_v0 = vmax.f32 %v538_v8, 0.0 }
 0x147   :  { %v437_v5 = vsub.f32 1.5, %v436_v10  ;;  %v200_v16 = vpop.xlane.xlu1 %199 }
 0x148   :  { %v1221_v6 = vpop.eup %1220  ;;  %v365_v7 = vadd.f32 1e-05, %v333_v62  ;;  %v1670_v57 = vmul.f32 0.03125, %v200_v16 }
 0x149   :  { %v444_v3 = vmul.f32 %v1221_v6, %v364_v52  ;;  %v438_v12 = vmul.f32 %v1219_v51, %v437_v5  ;;  %vm450_vm6 = vweird.f32 %v1221_v6 }
 0x14a   :  { %1222 = vrsqrt.f32 %v365_v7  ;;  %vm451_vm8 = vmor %vm449_vm7, %vm450_vm6  ;;  %vm459_vm10 = vweird.f32 %v365_v7  ;;  %v302_v63 = vmul.f32 %v1670_v57, %v1670_v57 }
 0x14b   :  { %v445_v13 = vmul.f32 %v1221_v6, %v444_v3  ;;  %v442_v17 = vsel %vm441_vm5, %v1219_v51, %v438_v12 }
 0x14c   :  { %v539_v43 = vmul.f32 %v442_v17, %v347_v18 }
 0x14d   :  { %v446_v15 = vmul.f32 0.5, %v445_v13 }
 0x14e   :  { %616 = vmatmul.f32.gmra.mxu1 %v554_v0  ;;  %v555_v25 = vmax.f32 %v539_v43, 0.0 }
 0x14f   :  { %v447_v36 = vsub.f32 1.5, %v446_v15 }
 0x150   :  { %v1223_v38 = vpop.eup %1222 }
 0x151   :  { %v454_v26 = vmul.f32 %v1223_v38, %v365_v7  ;;  %v448_v20 = vmul.f32 %v1221_v6, %v447_v36  ;;  %vm460_vm9 = vweird.f32 %v1223_v38 }
 0x152   :  { %vm461_vm11 = vmor %vm459_vm10, %vm460_vm9 }
 0x153   :  { %v455_v22 = vmul.f32 %v1223_v38, %v454_v26  ;;  %v452_v28 = vsel %vm451_vm8, %v1221_v6, %v448_v20 }
 0x154   :  { %v540_v35 = vmul.f32 %v452_v28, %v348_v30 }
 0x155   :  { %v456_v27 = vmul.f32 0.5, %v455_v22 }
 0x156   :  { %619 = vmatmul.f32.gmra.mxu1 %v555_v25  ;;  %v556_v1 = vmax.f32 %v540_v35, 0.0 }
 0x157   :  { %v457_v34 = vsub.f32 1.5, %v456_v27 }
 0x159   :  { %v458_v39 = vmul.f32 %v1223_v38, %v457_v34 }
 0x15b   :  { %v462_v21 = vsel %vm461_vm11, %v1223_v38, %v458_v39 }
 0x15c   :  { %v541_v55 = vmul.f32 %v462_v21, %v349_v9 }
 0x15e   :  { %622 = vmatmul.f32.gmra.mxu1 %v556_v1  ;;  %v557_v44 = vmax.f32 %v541_v55, 0.0 }
 0x15f   :  { %v206_v19 = vpop.xlane.xlu0 %205 }
 0x160   :  { %v273_v40 = vmul.f32 0.03125, %v206_v19 }
 0x161   :  { %v254_v29 = vpop.xlane.xlu2 %253 }
 0x162   :  { %v305_v41 = vmul.f32 %v273_v40, %v273_v40  ;;  %v289_v42 = vmul.f32 0.03125, %v254_v29  ;;  %v353_v22 = vsub.f32 %v1517_v54, %v273_v40 }
 0x164   :  { %v321_v32 = vsub.f32 %v289_v42, %v305_v41 }
 0x166   :  { %v337_v46 = vmax.f32 %v321_v32, 0.0  ;;  %625 = vmatmul.f32.gmra.mxu1 %v557_v44 }
 0x167   :  { %v208_v49 = vpop.xlane.xlu1 %207 }
 0x168   :  { %v369_v50 = vadd.f32 1e-05, %v337_v46  ;;  %v1666_v47 = vmul.f32 0.03125, %v208_v49 }
 0x169   :  { %v256_v51 = vpop.xlane.xlu0 %255 }
 0x16a   :  { %1224 = vrsqrt.f32 %v369_v50  ;;  %v306_v45 = vmul.f32 %v1666_v47, %v1666_v47  ;;  %v290_v52 = vmul.f32 0.03125, %v256_v51  ;;  %vm499_vm13 = vweird.f32 %v369_v50 }
 0x16b   :  { %v354_v46 = vsub.f32 %v1535_v61, %v1666_v47 }
 0x16c   :  { %v322_v53 = vsub.f32 %v290_v52, %v306_v45 }
 0x16e   :  { %v338_v56 = vmax.f32 %v322_v53, 0.0 }
 0x16f   :  { %v210_v58 = vpop.xlane.xlu2 %209 }
 0x170   :  { %v1225_v37 = vpop.eup %1224  ;;  %v370_v59 = vadd.f32 1e-05, %v338_v56  ;;  %v1672_v23 = vmul.f32 0.03125, %v210_v58 }
 0x171   :  { %v494_v31 = vmul.f32 %v1225_v37, %v369_v50  ;;  %v258_v60 = vpop.xlane.xlu1 %257  ;;  %v248_v33 = vpop.xlane.xlu0 %247  ;;  %vm500_vm12 = vweird.f32 %v1225_v37 }
 0x172   :  { %1226 = vrsqrt.f32 %v370_v59  ;;  %v307_v10 = vmul.f32 %v1672_v23, %v1672_v23  ;;  %v291_v62 = vmul.f32 0.03125, %v258_v60  ;;  %v286_v5 = vmul.f32 0.03125, %v248_v33  ;;  %vm501_vm14 = vmor %vm499_vm13, %vm500_vm12 }
 0x173   :  { %v495_v2 = vmul.f32 %v1225_v37, %v494_v31  ;;  %vm509_vm0 = vweird.f32 %v370_v59 }
 0x174   :  { %v323_v6 = vsub.f32 %v291_v62, %v307_v10  ;;  %v318_v7 = vsub.f32 %v286_v5, %v302_v63 }
 0x175   :  { %v496_v3 = vmul.f32 0.5, %v495_v2 }
 0x176   :  { %v339_v8 = vmax.f32 %v323_v6, 0.0  ;;  %v334_v12 = vmax.f32 %v318_v7, 0.0 }
 0x177   :  { %v202_v13 = vpop.xlane.xlu2 %201  ;;  %v497_v0 = vsub.f32 1.5, %v496_v3  ;;  %v355_v3 = vsub.f32 %v1553_v4, %v1672_v23 }
 0x178   :  { %v1227_v15 = vpop.eup %1226  ;;  %v1678_v17 = vadd.f32 1e-05, %v339_v8  ;;  %v1680_v18 = vmul.f32 0.03125, %v202_v13  ;;  %v1682_v38 = vadd.f32 1e-05, %v334_v12  ;;  %v350_v12 = vsub.f32 %v1505_v48, %v1670_v57 }
 0x179   :  { %v504_v36 = vmul.f32 %v1227_v15, %v370_v59  ;;  %v250_v26 = vpop.xlane.xlu1 %249  ;;  %v212_v43 = vpop.xlane.xlu0 %211  ;;  %v498_v20 = vmul.f32 %v1225_v37, %v497_v0  ;;  %vm510_vm15 = vweird.f32 %v1227_v15 }
 0x17a   :  { %1228 = vrsqrt.f32 %v1678_v17  ;;  %v303_v25 = vmul.f32 %v1680_v18, %v1680_v18  ;;  %v287_v27 = vmul.f32 0.03125, %v250_v26  ;;  %v1689_v35 = vmul.f32 0.03125, %v212_v43  ;;  %vm511_vm1 = vmor %vm509_vm0, %vm510_vm15 }
 0x17b   :  { %v505_v28 = vmul.f32 %v1227_v15, %v504_v36  ;;  %1230 = vrsqrt.f32 %v1682_v38  ;;  %v502_v30 = vsel %vm501_vm14, %v1225_v37, %v498_v20  ;;  %vm519_vm2 = vweird.f32 %v1678_v17 }
 0x17c   :  { %v319_v34 = vsub.f32 %v287_v27, %v303_v25  ;;  %v545_v39 = vmul.f32 %v502_v30, %v353_v22  ;;  %v308_v54 = vmul.f32 %v1689_v35, %v1689_v35  ;;  %vm469_vm5 = vweird.f32 %v1682_v38 }
 0x17d   :  { %v506_v1 = vmul.f32 0.5, %v505_v28  ;;  %v351_v48 = vsub.f32 %v1570_v11, %v1680_v18 }
 0x17e   :  { %v335_v21 = vmax.f32 %v319_v34, 0.0  ;;  %v561_v9 = vmax.f32 %v545_v39, 0.0 }
 0x17f   :  { %v260_v16 = vpop.xlane.xlu2 %259  ;;  %v507_v19 = vsub.f32 1.5, %v506_v1 }
 0x180   :  { %v1229_v40 = vpop.eup %1228  ;;  %v1693_v29 = vadd.f32 1e-05, %v335_v21  ;;  %v292_v55 = vmul.f32 0.03125, %v260_v16  ;;  %637 = vmatmul.f32.vlgmr.msra.gmra.mxu3 %v561_v9  ;;  %v356_v16 = vsub.f32 %v1576_v14, %v1689_v35  ;;  %v1722_v14 = vld [vmem:[%s1965_s4] ss:$0 sm:$0xff] }
 0x181   :  { %v1231_v41 = vpop.eup %1230  ;;  %v514_v42 = vmul.f32 %v1229_v40, %v1678_v17  ;;  %v204_v32 = vpop.xlane.xlu0 %203  ;;  %v508_v44 = vmul.f32 %v1227_v15, %v507_v19  ;;  %vm520_vm3 = vweird.f32 %v1229_v40 }
 0x182   :  { %v464_v49 = vmul.f32 %v1231_v41, %v1682_v38  ;;  %1232 = vrsqrt.f32 %v1693_v29  ;;  %v324_v50 = vsub.f32 %v292_v55, %v308_v54  ;;  %v252_v51 = vpop.xlane.xlu1 %251  ;;  %v1701_v52 = vmul.f32 0.03125, %v204_v32  ;;  %vm521_vm6 = vmor %vm519_vm2, %vm520_vm3 }
 0x183   :  { %v515_v45 = vmul.f32 %v1229_v40, %v514_v42  ;;  %v512_v53 = vsel %vm511_vm1, %v1227_v15, %v508_v44  ;;  %v288_v31 = vmul.f32 0.03125, %v252_v51  ;;  %vm470_vm4 = vweird.f32 %v1231_v41 }
 0x184   :  { %v465_v56 = vmul.f32 %v1231_v41, %v464_v49  ;;  %v340_v58 = vmax.f32 %v324_v50, 0.0  ;;  %v546_v37 = vmul.f32 %v512_v53, %v354_v46  ;;  %v304_v59 = vmul.f32 %v1701_v52, %v1701_v52  ;;  %vm471_vm7 = vmor %vm469_vm5, %vm470_vm4 }
 0x185   :  { %v516_v61 = vmul.f32 0.5, %v515_v45  ;;  %vm479_vm9 = vweird.f32 %v1693_v29 }
 0x186   :  { %v372_v47 = vadd.f32 1e-05, %v340_v58  ;;  %v562_v60 = vmax.f32 %v546_v37, 0.0  ;;  %v466_v33 = vmul.f32 0.5, %v465_v56  ;;  %v320_v10 = vsub.f32 %v288_v31, %v304_v59 }
 0x187   :  { %v517_v62 = vsub.f32 1.5, %v516_v61 }
 0x188   :  { %v1233_v63 = vpop.eup %1232  ;;  %1234 = vrsqrt.f32 %v372_v47  ;;  %640 = vmatmul.f32.gmra.mxu3 %v562_v60  ;;  %v467_v2 = vsub.f32 1.5, %v466_v33  ;;  %v336_v6 = vmax.f32 %v320_v10, 0.0  ;;  %vm529_vm12 = vweird.f32 %v372_v47 }
 0x189   :  { %v474_v5 = vmul.f32 %v1233_v63, %v1693_v29  ;;  %v518_v7 = vmul.f32 %v1229_v40, %v517_v62  ;;  %vm480_vm8 = vweird.f32 %v1233_v63 }
 0x18a   :  { %v468_v8 = vmul.f32 %v1231_v41, %v467_v2  ;;  %v368_v0 = vadd.f32 1e-05, %v336_v6  ;;  %vm481_vm10 = vmor %vm479_vm9, %vm480_vm8 }
 0x18b   :  { %v475_v13 = vmul.f32 %v1233_v63, %v474_v5  ;;  %v522_v15 = vsel %vm521_vm6, %v1229_v40, %v518_v7 }
 0x18c   :  { %v472_v17 = vsel %vm471_vm7, %v1231_v41, %v468_v8  ;;  %v547_v36 = vmul.f32 %v522_v15, %v355_v3  ;;  %1236 = vrsqrt.f32 %v368_v0  ;;  %vm489_vm15 = vweird.f32 %v368_v0  ;;  %v1046_v15 = vld [vmem:[#allocation3 + $0x60] sm:$0xff] }
 0x18d   :  { %v542_v26 = vmul.f32 %v472_v17, %v350_v12  ;;  %v476_v43 = vmul.f32 0.5, %v475_v13  ;;  %v352_v41 = vsub.f32 %v1592_v24, %v1701_v52  ;;  %v1049_v12 = vld [vmem:[#allocation3 + $0x78] sm:$0xff]  ;;  %v1048_v13 = vld [vmem:[#allocation3 + $0x70] sm:$0xff] }
 0x18e   :  { %v1235_v20 = vpop.eup %1234  ;;  %v563_v22 = vmax.f32 %v547_v36, 0.0  ;;  %1052 = vmatpush.msra.mxu2 %v1049_v12  ;;  %1184 = vmatpush.msrb.mxu3 %v1049_v12  ;;  %v1045_v36 = vld [vmem:[#allocation3 + $0x58] sm:$0xff] }
 0x18f   :  { %v524_v25 = vmul.f32 %v1235_v20, %v372_v47  ;;  %v558_v4 = vmax.f32 %v542_v26, 0.0  ;;  %v477_v23 = vsub.f32 1.5, %v476_v43  ;;  %vm530_vm11 = vweird.f32 %v1235_v20  ;;  %v1044_v26 = vld [vmem:[#allocation3 + $0x50] sm:$0xff]  ;;  %v1043_v43 = vld [vmem:[#allocation3 + $0x48] sm:$0xff] }
 0x190   :  { %643 = vmatmul.f32.gmra.mxu3 %v563_v22  ;;  %vm531_vm13 = vmor %vm529_vm12, %vm530_vm11  ;;  %1053 = vmatpush.msra.mxu2 %v1048_v13 }
 0x191   :  { %v525_v38 = vmul.f32 %v1235_v20, %v524_v25  ;;  %628 = vmatmul.f32.gmra.mxu1 %v558_v4  ;;  %v478_v27 = vmul.f32 %v1233_v63, %v477_v23  ;;  %1185 = vmatpush.msrb.mxu3 %v1048_v13  ;;  %v1041_v4 = vld [vmem:[#allocation3 + $0x38] sm:$0xff] }
 0x192   :  { %v1237_v57 = vpop.eup %1236 }
 0x193   :  { %v482_v28 = vsel %vm481_vm10, %v1233_v63, %v478_v27  ;;  %v526_v30 = vmul.f32 0.5, %v525_v38  ;;  %v484_v34 = vmul.f32 %v1237_v57, %v368_v0  ;;  %vm490_vm14 = vweird.f32 %v1237_v57  ;;  %v1047_v0 = vld [vmem:[#allocation3 + $0x68] sm:$0xff]  ;;  %v1040_v38 = vld [vmem:[#allocation3 + $0x30] sm:$0xff] }
 0x194   :  { %v543_v39 = vmul.f32 %v482_v28, %v351_v48  ;;  %vm491_vm0 = vmor %vm489_vm15, %vm490_vm14  ;;  %1054 = vmatpush.msra.mxu2 %v1047_v0  ;;  %1186 = vmatpush.msrb.mxu3 %v1047_v0  ;;  %v1039_v48 = vld [vmem:[#allocation3 + $0x28] sm:$0xff]  ;;  %v1038_v28 = vld [vmem:[#allocation3 + $0x20] sm:$0xff] }
 0x195   :  { %v527_v1 = vsub.f32 1.5, %v526_v30  ;;  %v485_v54 = vmul.f32 %v1237_v57, %v484_v34  ;;  %v1037_v30 = vld [vmem:[#allocation3 + $0x18] sm:$0xff] }
 0x196   :  { %v559_v21 = vmax.f32 %v543_v39, 0.0  ;;  %1055 = vmatpush.msra.mxu2 %v1046_v15  ;;  %1187 = vmatpush.msrb.mxu3 %v1046_v15 }
 0x197   :  { %v528_v9 = vmul.f32 %v1235_v20, %v527_v1  ;;  %v486_v19 = vmul.f32 0.5, %v485_v54  ;;  %v1036_v1 = vld [vmem:[#allocation3 + $0x10] sm:$0xff] }
 0x198   :  { %1056 = vmatpush.msra.mxu2 %v1045_v36  ;;  %1188 = vmatpush.msrb.mxu3 %v1045_v36 }
 0x199   :  { %631 = vmatmul.f32.gmra.mxu1 %v559_v21  ;;  %v532_v40 = vsel %vm531_vm13, %v1235_v20, %v528_v9  ;;  %v487_v18 = vsub.f32 1.5, %v486_v19  ;;  %v1042_v20 = vld [vmem:[#allocation3 + $0x40] sm:$0xff]  ;;  %v1035_v9 = vld [vmem:[#allocation3 + $0x8] sm:$0xff] }
 0x19a   :  { %v548_v11 = vmul.f32 %v532_v40, %v356_v16  ;;  %1057 = vmatpush.msra.mxu2 %v1044_v26  ;;  %1189 = vmatpush.msrb.mxu3 %v1044_v26  ;;  %v1034_v40 = vld [vmem:[#allocation3] sm:$0xff] }
 0x19b   :  { %v488_v55 = vmul.f32 %v1237_v57, %v487_v18 }
 0x19c   :  { %v564_v29 = vmax.f32 %v548_v11, 0.0  ;;  %1058 = vmatpush.msra.mxu2 %v1043_v43  ;;  %1190 = vmatpush.msrb.mxu3 %v1043_v43 }
 0x19d   :  { %v492_v42 = vsel %vm491_vm0, %v1237_v57, %v488_v55 }
 0x19e   :  { %646 = vmatmul.f32.gmra.mxu3 %v564_v29  ;;  %v544_v32 = vmul.f32 %v492_v42, %v352_v41  ;;  %1059 = vmatpush.msra.mxu2 %v1042_v20 }
 0x19f   :  { %1191 = vmatpush.msrb.mxu3 %v1042_v20 }
 0x1a0   :  { %v560_v44 = vmax.f32 %v544_v32, 0.0  ;;  %1060 = vmatpush.msra.mxu2 %v1041_v4 }
 0x1a1   :  { %1192 = vmatpush.msrb.mxu3 %v1041_v4 }
 0x1a2   :  { %634 = vmatmul.f32.gmra.mxu1 %v560_v44  ;;  %1061 = vmatpush.msra.mxu2 %v1040_v38 }
 0x1a3   :  { %v602_v35 = vpop.f32.mrf.mxu1  ;;  %1193 = vmatpush.msrb.mxu3 %v1040_v38 }
 0x1a4   :  { %v1725_v46 = vadd.f32 %v1722_v14, %v602_v35  ;;  %1062 = vmatpush.msra.mxu2 %v1039_v48 }
 0x1a5   :  { %1194 = vmatpush.msrb.mxu3 %v1039_v48 }
 0x1a6   :  { %650 = vadd.xlane.f32.xlu2 %v1725_v46  ;;  %v682_v24 = vmul.f32 %v1725_v46, %v1725_v46  ;;  %1063 = vmatpush.msra.mxu2 %v1038_v28 }
 0x1a7   :  { %1195 = vmatpush.msrb.mxu3 %v1038_v28 }
 0x1a8   :  { %698 = vadd.xlane.f32.xlu0 %v682_v24  ;;  %1064 = vmatpush.msra.mxu2 %v1037_v30 }
 0x1a9   :  { %1196 = vmatpush.msrb.mxu3 %v1037_v30 }
 0x1aa   :  { %1065 = vmatpush.msra.mxu2 %v1036_v1 }
 0x1ab   :  { %v605_v49 = vpop.f32.mrf.mxu1  ;;  %1197 = vmatpush.msrb.mxu3 %v1036_v1 }
 0x1ac   :  { %v1731_v50 = vadd.f32 %v1722_v14, %v605_v49  ;;  %1066 = vmatpush.msra.mxu2 %v1035_v9 }
 0x1ad   :  { %1198 = vmatpush.msrb.mxu3 %v1035_v9 }
 0x1ae   :  { %652 = vadd.xlane.f32.xlu1 %v1731_v50  ;;  %v683_v51 = vmul.f32 %v1731_v50, %v1731_v50  ;;  %1067 = vmatpush.msra.mxu2 %v1034_v40 }
 0x1af   :  { %1199 = vmatpush.msrb.mxu3 %v1034_v40 }
 0x1b0   :  { %700 = vadd.xlane.f32.xlu2 %v683_v51 }
 0x1b3   :  { %v608_v45 = vpop.f32.mrf.mxu1 }
 0x1b4   :  { %v1737_v52 = vadd.f32 %v1722_v14, %v608_v45 }
 0x1b6   :  { %654 = vadd.xlane.f32.xlu0 %v1737_v52  ;;  %v684_v53 = vmul.f32 %v1737_v52, %v1737_v52 }
 0x1b8   :  { %702 = vadd.xlane.f32.xlu1 %v684_v53 }
 0x1bb   :  { %v611_v56 = vpop.f32.mrf.mxu1 }
 0x1bc   :  { %v1743_v58 = vadd.f32 %v1722_v14, %v611_v56 }
 0x1be   :  { %656 = vadd.xlane.f32.xlu2 %v1743_v58  ;;  %v685_v37 = vmul.f32 %v1743_v58, %v1743_v58 }
 0x1c0   :  { %704 = vadd.xlane.f32.xlu0 %v685_v37 }
 0x1c3   :  { %v614_v31 = vpop.f32.mrf.mxu1 }
 0x1c4   :  { %v1749_v59 = vadd.f32 %v1722_v14, %v614_v31 }
 0x1c6   :  { %658 = vadd.xlane.f32.xlu1 %v1749_v59  ;;  %v686_v61 = vmul.f32 %v1749_v59, %v1749_v59 }
 0x1c8   :  { %706 = vadd.xlane.f32.xlu2 %v686_v61 }
 0x1cb   :  { %v617_v47 = vpop.f32.mrf.mxu1 }
 0x1cc   :  { %v1755_v60 = vadd.f32 %v1722_v14, %v617_v47 }
 0x1ce   :  { %660 = vadd.xlane.f32.xlu0 %v1755_v60  ;;  %v687_v33 = vmul.f32 %v1755_v60, %v1755_v60 }
 0x1d0   :  { %708 = vadd.xlane.f32.xlu1 %v687_v33 }
 0x1d3   :  { %v620_v10 = vpop.f32.mrf.mxu1 }
 0x1d4   :  { %v1761_v62 = vadd.f32 %v1722_v14, %v620_v10 }
 0x1d6   :  { %662 = vadd.xlane.f32.xlu2 %v1761_v62  ;;  %v688_v63 = vmul.f32 %v1761_v62, %v1761_v62 }
 0x1d8   :  { %710 = vadd.xlane.f32.xlu0 %v688_v63 }
 0x1db   :  { %v623_v2 = vpop.f32.mrf.mxu1 }
 0x1dc   :  { %v1767_v5 = vadd.f32 %v1722_v14, %v623_v2 }
 0x1de   :  { %664 = vadd.xlane.f32.xlu1 %v1767_v5  ;;  %v689_v6 = vmul.f32 %v1767_v5, %v1767_v5 }
 0x1e0   :  { %712 = vadd.xlane.f32.xlu2 %v689_v6 }
 0x1e3   :  { %v626_v7 = vpop.f32.mrf.mxu1 }
 0x1e4   :  { %v1773_v3 = vadd.f32 %v1722_v14, %v626_v7 }
 0x1e6   :  { %666 = vadd.xlane.f32.xlu0 %v1773_v3  ;;  %v690_v8 = vmul.f32 %v1773_v3, %v1773_v3 }
 0x1e8   :  { %714 = vadd.xlane.f32.xlu2 %v690_v8 }
 0x203   :  { %v638_v17 = vpop.f32.mrf.mxu3 }
 0x204   :  { %v1789_v34 = vadd.f32 %v1722_v14, %v638_v17 }
 0x206   :  { %v694_v16 = vmul.f32 %v1789_v34, %v1789_v34 }
 0x20b   :  { %v641_v22 = vpop.f32.mrf.mxu3 }
 0x20c   :  { %v1779_v25 = vadd.f32 %v1722_v14, %v641_v22 }
 0x20e   :  { %v629_v23 = vpop.f32.mrf.mxu1  ;;  %676 = vadd.xlane.f32.xlu2 %v1779_v25  ;;  %v695_v44 = vmul.f32 %v1779_v25, %v1779_v25 }
 0x20f   :  { %v1783_v27 = vadd.f32 %v1722_v14, %v629_v23 }
 0x211   :  { %668 = vadd.xlane.f32.xlu1 %v1783_v27  ;;  %v691_v57 = vmul.f32 %v1783_v27, %v1783_v27 }
 0x213   :  { %716 = vadd.xlane.f32.xlu0 %v691_v57  ;;  %v644_v54 = vpop.f32.mrf.mxu3 }
 0x214   :  { %v1799_v11 = vadd.f32 %v1722_v14, %v644_v54 }
 0x216   :  { %v632_v39 = vpop.f32.mrf.mxu1  ;;  %v696_v32 = vmul.f32 %v1799_v11, %v1799_v11 }
 0x217   :  { %v1792_v21 = vadd.f32 %v1722_v14, %v632_v39 }
 0x219   :  { %670 = vadd.xlane.f32.xlu2 %v1792_v21  ;;  %674 = vadd.xlane.f32.xlu1 %v1789_v34  ;;  %v651_v19 = vpop.xlane.xlu2 %650  ;;  %v692_v47 = vmul.f32 %v1792_v21, %v1792_v21 }
 0x21a   :  { %v1801_v18 = vmul.f32 0.03125, %v651_v19 }
 0x21b   :  { %722 = vadd.xlane.f32.xlu0 %v694_v16  ;;  %v699_v29 = vpop.xlane.xlu0 %698 }
 0x21c   :  { %v762_v55 = vmul.f32 %v1801_v18, %v1801_v18  ;;  %v746_v41 = vmul.f32 0.03125, %v699_v29  ;;  %v810_v39 = vsub.f32 %v1725_v46, %v1801_v18 }
 0x21e   :  { %v778_v42 = vsub.f32 %v746_v41, %v762_v55 }
 0x21f   :  { %v635_v35 = vpop.f32.mrf.mxu1 }
 0x220   :  { %v794_v24 = vmax.f32 %v778_v42, 0.0  ;;  %v1810_v45 = vadd.f32 %v1722_v14, %v635_v35 }
 0x221   :  { %726 = vadd.xlane.f32.xlu2 %v696_v32  ;;  %724 = vadd.xlane.f32.xlu1 %v695_v44  ;;  %v653_v49 = vpop.xlane.xlu1 %652  ;;  %v647_v63 = vpop.f32.mrf.mxu3 }
 0x222   :  { %v826_v51 = vadd.f32 1e-05, %v794_v24  ;;  %v1812_v53 = vmul.f32 0.03125, %v653_v49  ;;  %v693_v33 = vmul.f32 %v1810_v45, %v1810_v45  ;;  %v1825_v0 = vadd.f32 %v1722_v14, %v647_v63 }
 0x223   :  { %678 = vadd.xlane.f32.xlu0 %v1799_v11  ;;  %v701_v56 = vpop.xlane.xlu2 %700 }
 0x224   :  { %1238 = vrsqrt.f32 %v826_v51  ;;  %v763_v37 = vmul.f32 %v1812_v53, %v1812_v53  ;;  %v747_v31 = vmul.f32 0.03125, %v701_v56  ;;  %v697_v22 = vmul.f32 %v1825_v0, %v1825_v0 }
 0x225   :  { %vm848_vm2 = vweird.f32 %v826_v51 }
 0x226   :  { %v779_v61 = vsub.f32 %v747_v31, %v763_v37 }
 0x228   :  { %v795_v10 = vmax.f32 %v779_v61, 0.0 }
 0x229   :  { %718 = vadd.xlane.f32.xlu1 %v692_v47  ;;  %720 = vadd.xlane.f32.xlu2 %v693_v33  ;;  %v655_v2 = vpop.xlane.xlu0 %654 }
 0x22a   :  { %v1239_v6 = vpop.eup %1238  ;;  %v827_v7 = vadd.f32 1e-05, %v795_v10  ;;  %v1821_v8 = vmul.f32 0.03125, %v655_v2 }
 0x22b   :  { %672 = vadd.xlane.f32.xlu0 %v1810_v45  ;;  %v843_v12 = vmul.f32 %v1239_v6, %v826_v51  ;;  %v703_v13 = vpop.xlane.xlu1 %702  ;;  %vm849_vm1 = vweird.f32 %v1239_v6  ;;  %v811_v51 = vsub.f32 %v1731_v50, %v1812_v53 }
 0x22c   :  { %1240 = vrsqrt.f32 %v827_v7  ;;  %v764_v15 = vmul.f32 %v1821_v8, %v1821_v8  ;;  %v748_v17 = vmul.f32 0.03125, %v703_v13  ;;  %vm850_vm3 = vmor %vm848_vm2, %vm849_vm1  ;;  %vm858_vm5 = vweird.f32 %v827_v7 }
 0x22d   :  { %v844_v36 = vmul.f32 %v1239_v6, %v843_v12 }
 0x22e   :  { %v780_v26 = vsub.f32 %v748_v17, %v764_v15 }
 0x22f   :  { %v845_v43 = vmul.f32 0.5, %v844_v36  ;;  %v812_v36 = vsub.f32 %v1737_v52, %v1821_v8 }
 0x230   :  { %v796_v20 = vmax.f32 %v780_v26, 0.0 }
 0x231   :  { %680 = vadd.xlane.f32.xlu1 %v1825_v0  ;;  %v657_v4 = vpop.xlane.xlu2 %656  ;;  %v846_v23 = vsub.f32 1.5, %v845_v43 }
 0x232   :  { %v1241_v38 = vpop.eup %1240  ;;  %v828_v14 = vadd.f32 1e-05, %v796_v20  ;;  %v1832_v48 = vmul.f32 0.03125, %v657_v4 }
 0x233   :  { %728 = vadd.xlane.f32.xlu0 %v697_v22  ;;  %v853_v57 = vmul.f32 %v1241_v38, %v827_v7  ;;  %v705_v28 = vpop.xlane.xlu0 %704  ;;  %v847_v30 = vmul.f32 %v1239_v6, %v846_v23  ;;  %vm859_vm4 = vweird.f32 %v1241_v38 }
 0x234   :  { %1242 = vrsqrt.f32 %v828_v14  ;;  %v765_v1 = vmul.f32 %v1832_v48, %v1832_v48  ;;  %v749_v54 = vmul.f32 0.03125, %v705_v28  ;;  %vm860_vm6 = vmor %vm858_vm5, %vm859_vm4  ;;  %vm868_vm8 = vweird.f32 %v828_v14 }
 0x235   :  { %v854_v9 = vmul.f32 %v1241_v38, %v853_v57  ;;  %v851_v16 = vsel %vm850_vm3, %v1239_v6, %v847_v30 }
 0x236   :  { %v781_v19 = vsub.f32 %v749_v54, %v765_v1  ;;  %v1002_v40 = vmul.f32 %v851_v16, %v810_v39  ;;  %v813_v16 = vsub.f32 %v1743_v58, %v1832_v48 }
 0x237   :  { %v855_v29 = vmul.f32 0.5, %v854_v9 }
 0x238   :  { %v797_v55 = vmax.f32 %v781_v19, 0.0  ;;  %v1018_v41 = vmax.f32 %v1002_v40, 0.0 }
 0x239   :  { %v659_v42 = vpop.xlane.xlu1 %658  ;;  %v856_v32 = vsub.f32 1.5, %v855_v29 }
 0x23a   :  { %v1243_v44 = vpop.eup %1242  ;;  %v829_v35 = vadd.f32 1e-05, %v797_v55  ;;  %v1838_v24 = vmul.f32 0.03125, %v659_v42  ;;  %1068 = vmatmul.f32.vlgmr.msra.gmra.mxu2 %v1018_v41 }
 0x23b   :  { %v863_v46 = vmul.f32 %v1243_v44, %v828_v14  ;;  %v707_v18 = vpop.xlane.xlu2 %706  ;;  %v857_v49 = vmul.f32 %v1241_v38, %v856_v32  ;;  %vm869_vm7 = vweird.f32 %v1243_v44 }
 0x23c   :  { %1244 = vrsqrt.f32 %v829_v35  ;;  %v766_v56 = vmul.f32 %v1838_v24, %v1838_v24  ;;  %v750_v37 = vmul.f32 0.03125, %v707_v18  ;;  %vm870_vm9 = vmor %vm868_vm8, %vm869_vm7  ;;  %vm878_vm11 = vweird.f32 %v829_v35 }
 0x23d   :  { %v864_v31 = vmul.f32 %v1243_v44, %v863_v46  ;;  %v861_v61 = vsel %vm860_vm6, %v1241_v38, %v857_v49 }
 0x23e   :  { %v782_v47 = vsub.f32 %v750_v37, %v766_v56  ;;  %v1003_v33 = vmul.f32 %v861_v61, %v811_v51 }
 0x23f   :  { %v865_v10 = vmul.f32 0.5, %v864_v31  ;;  %v814_v31 = vsub.f32 %v1749_v59, %v1838_v24 }
 0x240   :  { %v798_v63 = vmax.f32 %v782_v47, 0.0  ;;  %v1019_v2 = vmax.f32 %v1003_v33, 0.0 }
 0x241   :  { %v661_v6 = vpop.xlane.xlu0 %660  ;;  %v866_v12 = vsub.f32 1.5, %v865_v10 }
 0x242   :  { %v1245_v7 = vpop.eup %1244  ;;  %v830_v13 = vadd.f32 1e-05, %v798_v63  ;;  %v1844_v15 = vmul.f32 0.03125, %v661_v6  ;;  %1071 = vmatmul.f32.gmra.mxu2 %v1019_v2 }
 0x243   :  { %v873_v50 = vmul.f32 %v1245_v7, %v829_v35  ;;  %v709_v53 = vpop.xlane.xlu1 %708  ;;  %v867_v17 = vmul.f32 %v1243_v44, %v866_v12  ;;  %vm879_vm10 = vweird.f32 %v1245_v7 }
 0x244   :  { %1246 = vrsqrt.f32 %v830_v13  ;;  %v767_v26 = vmul.f32 %v1844_v15, %v1844_v15  ;;  %v751_v43 = vmul.f32 0.03125, %v709_v53  ;;  %vm880_vm12 = vmor %vm878_vm11, %vm879_vm10  ;;  %vm888_vm14 = vweird.f32 %v830_v13 }
 0x245   :  { %v874_v20 = vmul.f32 %v1245_v7, %v873_v50  ;;  %v871_v22 = vsel %vm870_vm9, %v1243_v44, %v867_v17 }
 0x246   :  { %v783_v4 = vsub.f32 %v751_v43, %v767_v26  ;;  %v1004_v23 = vmul.f32 %v871_v22, %v812_v36  ;;  %v815_v43 = vsub.f32 %v1755_v60, %v1844_v15 }
 0x247   :  { %v875_v38 = vmul.f32 0.5, %v874_v20 }
 0x248   :  { %v799_v57 = vmax.f32 %v783_v4, 0.0  ;;  %v1020_v28 = vmax.f32 %v1004_v23, 0.0 }
 0x249   :  { %v663_v30 = vpop.xlane.xlu2 %662  ;;  %v876_v39 = vsub.f32 1.5, %v875_v38 }
 0x24a   :  { %v1247_v14 = vpop.eup %1246  ;;  %v831_v1 = vadd.f32 1e-05, %v799_v57  ;;  %v1850_v54 = vmul.f32 0.03125, %v663_v30  ;;  %1074 = vmatmul.f32.gmra.mxu2 %v1020_v28 }
 0x24b   :  { %v883_v52 = vmul.f32 %v1247_v14, %v830_v13  ;;  %v711_v8 = vpop.xlane.xlu0 %710  ;;  %v877_v9 = vmul.f32 %v1245_v7, %v876_v39  ;;  %vm889_vm13 = vweird.f32 %v1247_v14 }
 0x24c   :  { %1248 = vrsqrt.f32 %v831_v1  ;;  %v768_v19 = vmul.f32 %v1850_v54, %v1850_v54  ;;  %v752_v40 = vmul.f32 0.03125, %v711_v8  ;;  %vm890_vm15 = vmor %vm888_vm14, %vm889_vm13  ;;  %vm898_vm1 = vweird.f32 %v831_v1 }
 0x24d   :  { %v884_v29 = vmul.f32 %v1247_v14, %v883_v52  ;;  %v881_v55 = vsel %vm880_vm12, %v1245_v7, %v877_v9  ;;  %v816_v60 = vsub.f32 %v1761_v62, %v1850_v54 }
 0x24e   :  { %v784_v41 = vsub.f32 %v752_v40, %v768_v19  ;;  %v1005_v42 = vmul.f32 %v881_v55, %v813_v16 }
 0x24f   :  { %v885_v32 = vmul.f32 0.5, %v884_v29 }
 0x250   :  { %v800_v44 = vmax.f32 %v784_v41, 0.0  ;;  %v1021_v46 = vmax.f32 %v1005_v42, 0.0 }
 0x251   :  { %v665_v18 = vpop.xlane.xlu1 %664  ;;  %v886_v49 = vsub.f32 1.5, %v885_v32 }
 0x252   :  { %v1249_v35 = vpop.eup %1248  ;;  %v832_v51 = vadd.f32 1e-05, %v800_v44  ;;  %v1856_v56 = vmul.f32 0.03125, %v665_v18  ;;  %1077 = vmatmul.f32.gmra.mxu2 %v1021_v46 }
 0x253   :  { %v893_v58 = vmul.f32 %v1249_v35, %v831_v1  ;;  %v713_v48 = vpop.xlane.xlu2 %712  ;;  %v887_v37 = vmul.f32 %v1247_v14, %v886_v49  ;;  %vm899_vm0 = vweird.f32 %v1249_v35 }
 0x254   :  { %1250 = vrsqrt.f32 %v832_v51  ;;  %v769_v61 = vmul.f32 %v1856_v56, %v1856_v56  ;;  %v753_v47 = vmul.f32 0.03125, %v713_v48  ;;  %vm900_vm2 = vmor %vm898_vm1, %vm899_vm0  ;;  %vm908_vm4 = vweird.f32 %v832_v51 }
 0x255   :  { %v894_v33 = vmul.f32 %v1249_v35, %v893_v58  ;;  %v891_v10 = vsel %vm890_vm15, %v1247_v14, %v887_v37  ;;  %v817_v44 = vsub.f32 %v1767_v5, %v1856_v56 }
 0x256   :  { %v785_v63 = vsub.f32 %v753_v47, %v769_v61  ;;  %v1006_v2 = vmul.f32 %v891_v10, %v814_v31 }
 0x257   :  { %v895_v6 = vmul.f32 0.5, %v894_v33 }
 0x258   :  { %v801_v12 = vmax.f32 %v785_v63, 0.0  ;;  %v1022_v7 = vmax.f32 %v1006_v2, 0.0 }
 0x259   :  { %v667_v50 = vpop.xlane.xlu0 %666  ;;  %v896_v53 = vsub.f32 1.5, %v895_v6 }
 0x25a   :  { %v1251_v13 = vpop.eup %1250  ;;  %v833_v17 = vadd.f32 1e-05, %v801_v12  ;;  %v738_v36 = vmul.f32 0.03125, %v667_v50  ;;  %1080 = vmatmul.f32.gmra.mxu2 %v1022_v7 }
 0x25b   :  { %v903_v59 = vmul.f32 %v1251_v13, %v832_v51  ;;  %v715_v24 = vpop.xlane.xlu2 %714  ;;  %v897_v26 = vmul.f32 %v1249_v35, %v896_v53  ;;  %vm909_vm3 = vweird.f32 %v1251_v13 }
 0x25c   :  { %1252 = vrsqrt.f32 %v833_v17  ;;  %v770_v20 = vmul.f32 %v738_v36, %v738_v36  ;;  %v754_v22 = vmul.f32 0.03125, %v715_v24  ;;  %vm910_vm5 = vmor %vm908_vm4, %vm909_vm3  ;;  %vm918_vm7 = vweird.f32 %v833_v17 }
 0x25d   :  { %v904_v4 = vmul.f32 %v1251_v13, %v903_v59  ;;  %v901_v23 = vsel %vm900_vm2, %v1249_v35, %v897_v26  ;;  %v818_v58 = vsub.f32 %v1773_v3, %v738_v36 }
 0x25e   :  { %v786_v38 = vsub.f32 %v754_v22, %v770_v20  ;;  %v1007_v57 = vmul.f32 %v901_v23, %v815_v43 }
 0x25f   :  { %v905_v28 = vmul.f32 0.5, %v904_v4 }
 0x260   :  { %v802_v30 = vmax.f32 %v786_v38, 0.0  ;;  %v1023_v39 = vmax.f32 %v1007_v57, 0.0 }
 0x261   :  { %v906_v14 = vsub.f32 1.5, %v905_v28 }
 0x262   :  { %v1253_v52 = vpop.eup %1252  ;;  %v834_v8 = vadd.f32 1e-05, %v802_v30  ;;  %1083 = vmatmul.f32.gmra.mxu2 %v1023_v39 }
 0x263   :  { %v913_v1 = vmul.f32 %v1253_v52, %v833_v17  ;;  %v907_v9 = vmul.f32 %v1251_v13, %v906_v14  ;;  %vm919_vm6 = vweird.f32 %v1253_v52 }
 0x264   :  { %1254 = vrsqrt.f32 %v834_v8  ;;  %vm920_vm8 = vmor %vm918_vm7, %vm919_vm6  ;;  %vm928_vm10 = vweird.f32 %v834_v8 }
 0x265   :  { %v914_v15 = vmul.f32 %v1253_v52, %v913_v1  ;;  %v911_v16 = vsel %vm910_vm5, %v1251_v13, %v907_v9 }
 0x266   :  { %v1008_v19 = vmul.f32 %v911_v16, %v816_v60 }
 0x267   :  { %v915_v40 = vmul.f32 0.5, %v914_v15 }
 0x268   :  { %v1024_v29 = vmax.f32 %v1008_v19, 0.0 }
 0x269   :  { %v916_v55 = vsub.f32 1.5, %v915_v40 }
 0x26a   :  { %v1255_v41 = vpop.eup %1254  ;;  %1086 = vmatmul.f32.gmra.mxu2 %v1024_v29 }
 0x26b   :  { %v923_v42 = vmul.f32 %v1255_v41, %v834_v8  ;;  %v917_v32 = vmul.f32 %v1253_v52, %v916_v55  ;;  %vm929_vm9 = vweird.f32 %v1255_v41 }
 0x26c   :  { %vm930_vm11 = vmor %vm928_vm10, %vm929_vm9 }
 0x26d   :  { %v924_v46 = vmul.f32 %v1255_v41, %v923_v42  ;;  %v921_v62 = vsel %vm920_vm8, %v1253_v52, %v917_v32 }
 0x26e   :  { %v1009_v54 = vmul.f32 %v921_v62, %v817_v44 }
 0x26f   :  { %v925_v18 = vmul.f32 0.5, %v924_v46 }
 0x270   :  { %v1025_v49 = vmax.f32 %v1009_v54, 0.0 }
 0x271   :  { %v926_v35 = vsub.f32 1.5, %v925_v18 }
 0x272   :  { %1089 = vmatmul.f32.gmra.mxu2 %v1025_v49 }
 0x273   :  { %v927_v51 = vmul.f32 %v1255_v41, %v926_v35 }
 0x275   :  { %v931_v48 = vsel %vm930_vm11, %v1255_v41, %v927_v51 }
 0x276   :  { %v1010_v37 = vmul.f32 %v931_v48, %v818_v58 }
 0x278   :  { %v1026_v31 = vmax.f32 %v1010_v37, 0.0 }
 0x27a   :  { %1092 = vmatmul.f32.gmra.mxu2 %v1026_v31 }
 0x281   :  { %v677_v61 = vpop.xlane.xlu2 %676 }
 0x282   :  { %v1873_v17 = vmul.f32 0.03125, %v677_v61 }
 0x284   :  { %v669_v5 = vpop.xlane.xlu1 %668  ;;  %v775_v20 = vmul.f32 %v1873_v17, %v1873_v17 }
 0x285   :  { %v739_v56 = vmul.f32 0.03125, %v669_v5 }
 0x286   :  { %v717_v47 = vpop.xlane.xlu0 %716 }
 0x287   :  { %v771_v33 = vmul.f32 %v739_v56, %v739_v56  ;;  %v755_v10 = vmul.f32 0.03125, %v717_v47  ;;  %v819_v18 = vsub.f32 %v1783_v27, %v739_v56 }
 0x289   :  { %v787_v63 = vsub.f32 %v755_v10, %v771_v33 }
 0x28b   :  { %v803_v2 = vmax.f32 %v787_v63, 0.0 }
 0x28c   :  { %v671_v6 = vpop.xlane.xlu2 %670  ;;  %v675_v12 = vpop.xlane.xlu1 %674 }
 0x28d   :  { %v835_v7 = vadd.f32 1e-05, %v803_v2  ;;  %v1869_v50 = vmul.f32 0.03125, %v675_v12  ;;  %v1882_v39 = vmul.f32 0.03125, %v671_v6 }
 0x28e   :  { %v723_v53 = vpop.xlane.xlu0 %722 }
 0x28f   :  { %1256 = vrsqrt.f32 %v835_v7  ;;  %v774_v3 = vmul.f32 %v1869_v50, %v1869_v50  ;;  %v758_v13 = vmul.f32 0.03125, %v723_v53  ;;  %v772_v19 = vmul.f32 %v1882_v39, %v1882_v39 }
 0x290   :  { %vm938_vm13 = vweird.f32 %v835_v7 }
 0x291   :  { %v790_v36 = vsub.f32 %v758_v13, %v774_v3 }
 0x293   :  { %v806_v59 = vmax.f32 %v790_v36, 0.0 }
 0x294   :  { %v727_v24 = vpop.xlane.xlu2 %726  ;;  %v725_v26 = vpop.xlane.xlu1 %724 }
 0x295   :  { %v1257_v43 = vpop.eup %1256  ;;  %v759_v22 = vmul.f32 0.03125, %v725_v26  ;;  %v1877_v23 = vadd.f32 1e-05, %v806_v59  ;;  %v760_v14 = vmul.f32 0.03125, %v727_v24  ;;  %v822_v26 = vsub.f32 %v1789_v34, %v1869_v50 }
 0x296   :  { %v933_v4 = vmul.f32 %v1257_v43, %v835_v7  ;;  %v679_v38 = vpop.xlane.xlu0 %678  ;;  %vm939_vm12 = vweird.f32 %v1257_v43 }
 0x297   :  { %v791_v57 = vsub.f32 %v759_v22, %v775_v20  ;;  %v1879_v28 = vmul.f32 0.03125, %v679_v38  ;;  %1258 = vrsqrt.f32 %v1877_v23  ;;  %vm940_vm14 = vmor %vm938_vm13, %vm939_vm12  ;;  %vm968_vm0 = vweird.f32 %v1877_v23 }
 0x298   :  { %v934_v30 = vmul.f32 %v1257_v43, %v933_v4 }
 0x299   :  { %v807_v52 = vmax.f32 %v791_v57, 0.0  ;;  %v776_v8 = vmul.f32 %v1879_v28, %v1879_v28 }
 0x29a   :  { %v935_v1 = vmul.f32 0.5, %v934_v30 }
 0x29b   :  { %v1886_v9 = vadd.f32 1e-05, %v807_v52  ;;  %v792_v60 = vsub.f32 %v760_v14, %v776_v8 }
 0x29c   :  { %v719_v15 = vpop.xlane.xlu1 %718  ;;  %v936_v16 = vsub.f32 1.5, %v935_v1  ;;  %v721_v55 = vpop.xlane.xlu2 %720 }
 0x29d   :  { %1260 = vrsqrt.f32 %v1886_v9  ;;  %v808_v40 = vmax.f32 %v792_v60, 0.0  ;;  %v756_v29 = vmul.f32 0.03125, %v719_v15  ;;  %v1259_v41 = vpop.eup %1258  ;;  %v757_v49 = vmul.f32 0.03125, %v721_v55 }
 0x29e   :  { %v673_v42 = vpop.xlane.xlu0 %672  ;;  %v937_v32 = vmul.f32 %v1257_v43, %v936_v16  ;;  %v963_v44 = vmul.f32 %v1259_v41, %v1877_v23  ;;  %vm969_vm15 = vweird.f32 %v1259_v41  ;;  %vm978_vm3 = vweird.f32 %v1886_v9 }
 0x29f   :  { %v1892_v46 = vadd.f32 1e-05, %v808_v40  ;;  %v788_v62 = vsub.f32 %v756_v29, %v772_v19  ;;  %v1894_v54 = vmul.f32 0.03125, %v673_v42  ;;  %vm970_vm1 = vmor %vm968_vm0, %vm969_vm15  ;;  %v823_v16 = vsub.f32 %v1779_v25, %v1873_v17 }
 0x2a0   :  { %v941_v35 = vsel %vm940_vm14, %v1257_v43, %v937_v32  ;;  %v964_v51 = vmul.f32 %v1259_v41, %v963_v44  ;;  %v820_v44 = vsub.f32 %v1792_v21, %v1882_v39 }
 0x2a1   :  { %1262 = vrsqrt.f32 %v1892_v46  ;;  %v804_v58 = vmax.f32 %v788_v62, 0.0  ;;  %v773_v48 = vmul.f32 %v1894_v54, %v1894_v54  ;;  %v1011_v37 = vmul.f32 %v941_v35, %v819_v18 }
 0x2a2   :  { %v965_v61 = vmul.f32 0.5, %v964_v51  ;;  %vm988_vm7 = vweird.f32 %v1892_v46  ;;  %v824_v51 = vsub.f32 %v1799_v11, %v1879_v28 }
 0x2a3   :  { %v1261_v31 = vpop.eup %1260  ;;  %v836_v5 = vadd.f32 1e-05, %v804_v58  ;;  %v789_v47 = vsub.f32 %v757_v49, %v773_v48  ;;  %v1027_v63 = vmax.f32 %v1011_v37, 0.0 }
 0x2a4   :  { %v973_v33 = vmul.f32 %v1261_v31, %v1886_v9  ;;  %v681_v10 = vpop.xlane.xlu1 %680  ;;  %v966_v2 = vsub.f32 1.5, %v965_v61  ;;  %vm979_vm2 = vweird.f32 %v1261_v31 }
 0x2a5   :  { %1264 = vrsqrt.f32 %v836_v5  ;;  %v805_v27 = vmax.f32 %v789_v47, 0.0  ;;  %v1901_v56 = vmul.f32 0.03125, %v681_v10  ;;  %1095 = vmatmul.f32.gmra.mxu2 %v1027_v63  ;;  %vm980_vm4 = vmor %vm978_vm3, %vm979_vm2  ;;  %vm948_vm8 = vweird.f32 %v836_v5 }
 0x2a6   :  { %v974_v6 = vmul.f32 %v1261_v31, %v973_v33  ;;  %v729_v12 = vpop.xlane.xlu0 %728  ;;  %v967_v59 = vmul.f32 %v1259_v41, %v966_v2  ;;  %v1935_v47 = vstv %s1967_s6  ;;  %s1325_s6 = smov [#allocation6]  }
 0x2a7   :  { %v1903_v7 = vpop.eup %1262  ;;  %v837_v53 = vadd.f32 1e-05, %v805_v27  ;;  %v777_v3 = vmul.f32 %v1901_v56, %v1901_v56  ;;  %v761_v13 = vmul.f32 0.03125, %v729_v12  ;;  %v825_v2 = vsub.f32 %v1825_v0, %v1901_v56  ;;  %s1137_s9 = sshll.u32 %s1325_s6, 4  ;;  %s1138_s9 = int_to_ptr.vmem [resolvable:$true] %s1137_s9 }
 0x2a8   :  { %v983_v36 = vmul.f32 %v1903_v7, %v1892_v46  ;;  %v975_v24 = vmul.f32 0.5, %v974_v6  ;;  %v971_v20 = vsel %vm970_vm1, %v1259_v41, %v967_v59  ;;  %vm989_vm5 = vweird.f32 %v1903_v7 }
 0x2a9   :  { %1266 = vrsqrt.f32 %v837_v53  ;;  %v793_v43 = vsub.f32 %v761_v13, %v777_v3  ;;  %v1014_v30 = vmul.f32 %v971_v20, %v822_v26  ;;  %vm1919_vm9 = vmor %vm988_vm7, %vm989_vm5  ;;  %vm958_vm12 = vweird.f32 %v837_v53 }
 0x2aa   :  { %v976_v22 = vsub.f32 1.5, %v975_v24  ;;  %v984_v4 = vmul.f32 %v1903_v7, %v983_v36 }
 0x2ab   :  { %v1265_v38 = vpop.eup %1264  ;;  %v809_v57 = vmax.f32 %v793_v43, 0.0  ;;  %v1030_v1 = vmax.f32 %v1014_v30, 0.0 }
 0x2ac   :  { %v943_v23 = vmul.f32 %v1265_v38, %v836_v5  ;;  %v977_v14 = vmul.f32 %v1261_v31, %v976_v22  ;;  %v985_v52 = vmul.f32 0.5, %v984_v4  ;;  %vm949_vm6 = vweird.f32 %v1265_v38 }
 0x2ad   :  { %v841_v8 = vadd.f32 1e-05, %v809_v57  ;;  %1104 = vmatmul.f32.vlgmr.msrb.gmra.mxu3 %v1030_v1  ;;  %vm950_vm10 = vmor %vm948_vm8, %vm949_vm6  ;;  %v821_v5 = vsub.f32 %v1810_v45, %v1894_v54 }
 0x2ae   :  { %v944_v34 = vmul.f32 %v1265_v38, %v943_v23  ;;  %v981_v50 = vsel %vm980_vm4, %v1261_v31, %v977_v14  ;;  %v986_v60 = vsub.f32 1.5, %v985_v52 }
 0x2af   :  { %v1267_v15 = vpop.eup %1266  ;;  %1268 = vrsqrt.f32 %v841_v8  ;;  %v1015_v29 = vmul.f32 %v981_v50, %v823_v16  ;;  %vm998_vm15 = vweird.f32 %v841_v8 }
 0x2b0   :  { %v953_v19 = vmul.f32 %v1267_v15, %v837_v53  ;;  %v945_v40 = vmul.f32 0.5, %v944_v34  ;;  %v987_v9 = vmul.f32 %v1903_v7, %v986_v60  ;;  %vm959_vm11 = vweird.f32 %v1267_v15 }
 0x2b1   :  { %v1031_v62 = vmax.f32 %v1015_v29, 0.0  ;;  %vm960_vm13 = vmor %vm958_vm12, %vm959_vm11 }
 0x2b2   :  { %v946_v55 = vsub.f32 1.5, %v945_v40  ;;  %v954_v41 = vmul.f32 %v1267_v15, %v953_v19  ;;  %v991_v46 = vsel %vm1919_vm9, %v1903_v7, %v987_v9 }
 0x2b3   :  { %v1016_v21 = vmul.f32 %v991_v46, %v824_v51 }
 0x2b4   :  { %v947_v42 = vmul.f32 %v1265_v38, %v946_v55  ;;  %v955_v25 = vmul.f32 0.5, %v954_v41 }
 0x2b5   :  { %v1269_v17 = vpop.eup %1268  ;;  %1107 = vmatmul.f32.gmra.mxu3 %v1031_v62  ;;  %v1032_v28 = vmax.f32 %v1016_v21, 0.0 }
 0x2b6   :  { %v993_v18 = vmul.f32 %v1269_v17, %v841_v8  ;;  %v951_v49 = vsel %vm950_vm10, %v1265_v38, %v947_v42  ;;  %v956_v35 = vsub.f32 1.5, %v955_v25  ;;  %vm999_vm14 = vweird.f32 %v1269_v17 }
 0x2b7   :  { %v1012_v58 = vmul.f32 %v951_v49, %v820_v44  ;;  %vm1000_vm0 = vmor %vm998_vm15, %vm999_vm14 }
 0x2b8   :  { %v994_v48 = vmul.f32 %v1269_v17, %v993_v18  ;;  %v957_v37 = vmul.f32 %v1267_v15, %v956_v35 }
 0x2b9   :  { %v1028_v31 = vmax.f32 %v1012_v58, 0.0 }
 0x2ba   :  { %v995_v39 = vmul.f32 0.5, %v994_v48  ;;  %v961_v61 = vsel %vm960_vm13, %v1267_v15, %v957_v37 }
 0x2bb   :  { %1098 = vmatmul.f32.gmra.mxu2 %v1028_v31  ;;  %v1013_v33 = vmul.f32 %v961_v61, %v821_v5 }
 0x2bc   :  { %v996_v11 = vsub.f32 1.5, %v995_v39 }
 0x2bd   :  { %v1069_v10 = vpop.f32.mrf.mxu2  ;;  %1110 = vmatmul.f32.gmra.mxu3 %v1032_v28  ;;  %v1029_v54 = vmax.f32 %v1013_v33, 0.0 }
 0x2be   :  { %v997_v63 = vmul.f32 %v1269_v17, %v996_v11  ;;  %v1070_v27 = vadd.f32 %v1069_v10, %v1935_v47 }
 0x2c0   :  { %v1001_v45 = vsel %vm1000_vm0, %v1269_v17, %v997_v63  ;;  %1117 = vst [vmem:[#allocation6] sm:$0xff] %v1070_v27 }
 0x2c1   :  { %v1017_v6 = vmul.f32 %v1001_v45, %v825_v2 }
 0x2c3   :  { %1101 = vmatmul.f32.gmra.mxu2 %v1029_v54  ;;  %v1033_v12 = vmax.f32 %v1017_v6, 0.0 }
 0x2c5   :  { %v1072_v7 = vpop.f32.mrf.mxu2  ;;  %1113 = vmatmul.f32.gmra.mxu3 %v1033_v12 }
 0x2c6   :  { %v1073_v53 = vadd.f32 %v1072_v7, %v1935_v47 }
 0x2c8   :  { %1118 = vst [vmem:[#allocation6 + $0x8] sm:$0xff] %v1073_v53 }
 0x2cd   :  { %v1075_v3 = vpop.f32.mrf.mxu2 }
 0x2ce   :  { %v1076_v13 = vadd.f32 %v1075_v3, %v1935_v47 }
 0x2d0   :  { %1119 = vst [vmem:[#allocation6 + $0x10] sm:$0xff] %v1076_v13 }
 0x2d5   :  { %v1078_v0 = vpop.f32.mrf.mxu2 }
 0x2d6   :  { %v1079_v56 = vadd.f32 %v1078_v0, %v1935_v47 }
 0x2d8   :  { %1120 = vst [vmem:[#allocation6 + $0x18] sm:$0xff] %v1079_v56 }
 0x2dd   :  { %v1081_v36 = vpop.f32.mrf.mxu2 }
 0x2de   :  { %v1082_v59 = vadd.f32 %v1081_v36, %v1935_v47 }
 0x2e0   :  { %1121 = vst [vmem:[#allocation6 + $0x20] sm:$0xff] %v1082_v59 }
 0x2e5   :  { %v1084_v24 = vpop.f32.mrf.mxu2 }
 0x2e6   :  { %v1085_v26 = vadd.f32 %v1084_v24, %v1935_v47 }
 0x2e8   :  { %1122 = vst [vmem:[#allocation6 + $0x28] sm:$0xff] %v1085_v26 }
 0x2ed   :  { %v1087_v43 = vpop.f32.mrf.mxu2 }
 0x2ee   :  { %v1088_v20 = vadd.f32 %v1087_v43, %v1935_v47 }
 0x2f0   :  { %1123 = vst [vmem:[#allocation6 + $0x30] sm:$0xff] %v1088_v20 }
 0x2f5   :  { %v1090_v22 = vpop.f32.mrf.mxu2 }
 0x2f6   :  { %v1091_v4 = vadd.f32 %v1090_v22, %v1935_v47 }
 0x2f8   :  { %1124 = vst [vmem:[#allocation6 + $0x38] sm:$0xff] %v1091_v4 }
 0x2fd   :  { %v1093_v38 = vpop.f32.mrf.mxu2 }
 0x2fe   :  { %v1094_v57 = vadd.f32 %v1093_v38, %v1935_v47 }
 0x300   :  { %1125 = vst [vmem:[#allocation6 + $0x40] sm:$0xff] %v1094_v57 }
 0x328   :  { %v1096_v30 = vpop.f32.mrf.mxu2 }
 0x329   :  { %v1097_v23 = vadd.f32 %v1096_v30, %v1935_v47 }
 0x32b   :  { %1126 = vst [vmem:[#allocation6 + $0x48] sm:$0xff] %v1097_v23 }
 0x330   :  { %v1105_v14 = vpop.f32.mrf.mxu3 }
 0x331   :  { %v1106_v52 = vadd.f32 %v1105_v14, %v1935_v47 }
 0x333   :  { %1129 = vst [vmem:[#allocation6 + $0x60] sm:$0xff] %v1106_v52 }
 0x338   :  { %v1108_v8 = vpop.f32.mrf.mxu3 }
 0x339   :  { %v1109_v1 = vadd.f32 %v1108_v8, %v1935_v47 }
 0x33b   :  { %1130 = vst [vmem:[#allocation6 + $0x68] sm:$0xff] %v1109_v1 }
 0x33e   :  { %v1099_v34 = vpop.f32.mrf.mxu2 }
 0x33f   :  { %v1100_v50 = vadd.f32 %v1099_v34, %v1935_v47 }
 0x340   :  { %v1111_v60 = vpop.f32.mrf.mxu3 }
 0x341   :  { %1127 = vst [vmem:[#allocation6 + $0x50] sm:$0xff] %v1100_v50  ;;  %v1112_v15 = vadd.f32 %v1111_v60, %v1935_v47 }
 0x343   :  { %1131 = vst [vmem:[#allocation6 + $0x70] sm:$0xff] %v1112_v15 }
 0x346   :  { %v1102_v16 = vpop.f32.mrf.mxu2 }
 0x347   :  { %v1103_v19 = vadd.f32 %v1102_v16, %v1935_v47 }
 0x348   :  { %v1114_v40 = vpop.f32.mrf.mxu3 }
 0x349   :  { %1128 = vst [vmem:[#allocation6 + $0x58] sm:$0xff] %v1103_v19  ;;  %v1115_v29 = vadd.f32 %v1114_v40, %v1935_v47 }
 0x34b   :  { %1132 = vst [vmem:[#allocation6 + $0x78] sm:$0xff] %v1115_v29 }
 0x34c   :  { %1145 = dma.vmem_to_hbm [thread:$0]  %s1138_s9, 2048, %s1140_s5, [#allocation5], %s1323_s29, %s1323_s29, %s1324_s30  }
 0x34d   :  { %1320 = dma.done.wait [#allocation5], 2048  }
 0x34e   :  { %1321 = vsyncadd [#allocation5], 4294965248 }
 0x34f   :  { %1150 = vsyncpa [#allocation4], 1 }
 0x350   :  { %1151 = vsyncpa [#allocation5], 1 }

</bundles_post_ra>
